<compile_context>
chip_gen: v7x
topology: tpu7x:2x2x1
jax: 0.10.0
libtpu: 0.0.40
codegen_flags: <defaults>
</compile_context>

<pallas_src>
import functools
import math

import jax
import jax.numpy as jnp
from jax import lax
from jax.experimental import pallas as pl
from jax.experimental.pallas import tpu as pltpu


# ----------------------------------------------------------------------------
# Wrapper-side weight fusion (done once, outside the kernel).
# ----------------------------------------------------------------------------
def _fuse_input_weights(w_f, w_b, H):
    """(4H, in_dim) fwd/bwd -> dense (in_dim, 8H). No zero padding: both
    directions' gate columns consume the same layer input."""
    def blk(w, k):                       # transposed gate block: (in_dim, H)
        return w[k * H:(k + 1) * H].T
    # PyTorch gate row index: i=0, f=1, g=2, o=3. Column order: i, f, o, g.
    return jnp.concatenate(
        [blk(w_f, 0), blk(w_b, 0), blk(w_f, 1), blk(w_b, 1),
         blk(w_f, 3), blk(w_b, 3), blk(w_f, 2), blk(w_b, 2)], axis=1)


def _fuse_hidden_weights(w_f, w_b, H):
    """(4H, H) fwd/bwd -> block-diagonal (2H, 8H) so [h_f | h_b] @ W gives both
    directions' recurrent gate terms in one MXU pass per step."""
    z = jnp.zeros((H, H), w_f.dtype)
    def blk(w, k):
        return w[k * H:(k + 1) * H].T    # (H, H)
    top = jnp.concatenate(
        [blk(w_f, 0), z, blk(w_f, 1), z, blk(w_f, 3), z, blk(w_f, 2), z], axis=1)
    bot = jnp.concatenate(
        [z, blk(w_b, 0), z, blk(w_b, 1), z, blk(w_b, 3), z, blk(w_b, 2)], axis=1)
    return jnp.concatenate([top, bot], axis=0)       # (2H, 8H)


def _fuse_bias(b_f, b_b, H):
    """(4H,) pre-summed (b_ih + b_hh) fwd/bwd -> (1, 8H), folded into the hoisted
    input projection (no per-step bias add, no per-batch broadcast slab)."""
    def blk(b, k):
        return b[k * H:(k + 1) * H]
    fused = jnp.concatenate(
        [blk(b_f, 0), blk(b_b, 0), blk(b_f, 1), blk(b_b, 1),
         blk(b_f, 3), blk(b_b, 3), blk(b_f, 2), blk(b_b, 2)])
    return fused[None, :]


def prepare_fused_params(params, rnn_hidden_size):
    """Flatten per-layer params into [wih_fused, whh_fused, bias_fused] * L."""
    H = rnn_hidden_size
    fused = []
    for p in params:
        fused.append(_fuse_input_weights(p["w_ih_f"], p["w_ih_b"], H))
        fused.append(_fuse_hidden_weights(p["w_hh_f"], p["w_hh_b"], H))
        fused.append(_fuse_bias(p["b_f"], p["b_b"], H))
    return fused


# ----------------------------------------------------------------------------
# Pallas kernel: entire bidirectional multi-layer LSTM.
# ----------------------------------------------------------------------------
def _encoder_kernel(x_ref, *refs, seq_len, batch, rnn_hidden, merge_sum):
    """refs = (wih_0, whh_0, b_0, ..., wih_{L-1}, whh_{L-1}, b_{L-1},
               out_ref, act_ref).

    x_ref   : (S*B, in_dim)   VMEM  layer-0 input slab, time-major rows
    wih_l   : (in_dim_l, 8H)  VMEM  dense fused input weights (pre-transposed)
    whh_l   : (2H, 8H)        VMEM  block-diagonal fused recurrent weights
    b_l     : (1, 8H)         VMEM  fused (b_ih + b_hh) bias
    out_ref : (S*B, OD)       VMEM  OD = H (merge 'sum') or 2H ('concat')
    act_ref : (S*B, 2H)       VMEM scratch: inter-layer activations in natural
                              time order [h_f(t) | h_b(t)]
    """
    out_ref, act_ref = refs[-2], refs[-1]
    w_refs = refs[:-2]
    num_layers = len(w_refs) // 3
    S, B, H = seq_len, batch, rnn_hidden

    # Lane masks (hoisted; shared by all layers / timesteps).
    gl = lax.broadcasted_iota(jnp.int32, (B, 8 * H), 1)
    fwd_gate = ((gl < H)
                | ((gl >= 2 * H) & (gl < 3 * H))
                | ((gl >= 4 * H) & (gl < 5 * H))
                | ((gl >= 6 * H) & (gl < 7 * H)))     # gate blocks 0,2,4,6 = fwd dir
    hl = lax.broadcasted_iota(jnp.int32, (B, 2 * H), 1)
    fwd_half = hl < H

    for layer in range(num_layers):
        wih = w_refs[3 * layer + 0][...]              # (in_l, 8H)
        whh = w_refs[3 * layer + 1][...]              # (2H, 8H)
        bias = w_refs[3 * layer + 2][...]             # (1, 8H)

        # ---- Hoisted input projection: ONE MXU pass per layer, M = S*B,
        #      bias folded in once (not per step).
        src = x_ref[...] if layer == 0 else act_ref[...]
        p = jnp.dot(src, wih, preferred_element_type=jnp.float32) + bias   # (S*B, 8H)

        # Per-step gate pre-activations with the fwd/bwd time mirroring applied up
        # front: forward gate lanes from time t, backward lanes from time S-1-t.
        # Full-vreg VPU selects, not on the serial recurrence dependence chain.
        p_rows = [p[t * B:(t + 1) * B] for t in range(S)]
        p_mix = [jnp.where(fwd_gate, p_rows[t], p_rows[S - 1 - t]) for t in range(S)]

        # ---- Serial recurrence: only h @ W_hh + cell update per step.
        # TODO(synk): for seq_len >~ 32, switch these unrolled Python loops to
        # lax.fori_loop + VMEM scratch to keep vreg pressure / code size flat.
        hs = [None] * S

        # t == 0 peeled: h = c = 0  =>  skip the h-matmul and the f*c term.
        sg = jax.nn.sigmoid(p_mix[0])                 # full 8H-lane vreg
        tg = jnp.tanh(p_mix[0])
        c = sg[:, 0:2 * H] * tg[:, 6 * H:8 * H]       # i * g
        h = sg[:, 4 * H:6 * H] * jnp.tanh(c)          # o * tanh(c)
        hs[0] = h

        for t in range(1, S):
            gates = p_mix[t] + jnp.dot(h, whh, preferred_element_type=jnp.float32)
            sg = jax.nn.sigmoid(gates)                # full 8H-lane vreg
            tg = jnp.tanh(gates)
            i_g = sg[:, 0:2 * H]
            f_g = sg[:, 2 * H:4 * H]
            o_g = sg[:, 4 * H:6 * H]
            g_g = tg[:, 6 * H:8 * H]
            c = f_g * c + i_g * g_g
            h = o_g * jnp.tanh(c)
            hs[t] = h                                 # [h_f(t) | h_b(S-1-t)]

        # Re-align the backward half to natural time order with one select (or sum)
        # per step; stage inter-layer activations in the VMEM scratch slab.
        # TODO(synk): at large seq_len*batch coalesce these row stores into one
        # lane-dense store (mostly matters on v5e's single vector-store slot).
        if layer == num_layers - 1:
            for t in range(S):
                if merge_sum:
                    row = hs[t][:, :H] + hs[S - 1 - t][:, H:]        # h_f(t)+h_b(t)
                else:
                    row = jnp.where(fwd_half, hs[t], hs[S - 1 - t])  # [h_f(t)|h_b(t)]
                out_ref[pl.ds(t * B, B), :] = row
        else:
            for t in range(S):
                act_ref[pl.ds(t * B, B), :] = jnp.where(
                    fwd_half, hs[t], hs[S - 1 - t])


# ----------------------------------------------------------------------------
# RNNEncoder forward (single pallas_call for the whole encoder).
# ----------------------------------------------------------------------------
def rnn_encoder_forward(token_embed, fused_params, rnn_hidden_size,
                        merge_mode="concat"):
    """token_embed: (seq_len, batch, emb_dim) float32.

    Returns (token_out, token_context) exactly like the PyTorch module:
      token_out     : (batch, hidden_size)
      token_context : (seq_len, batch, hidden_size)
    """
    # TODO(synk): inter-layer dropout (training-only in nn.LSTM) is not applied.
    seq_len, batch, emb_dim = token_embed.shape
    H = rnn_hidden_size
    merge_sum = merge_mode == "sum"
    out_dim = H if merge_sum else 2 * H

    # Row-major (seq, batch) merge is layout-free.
    x_flat = token_embed.reshape(seq_len * batch, emb_dim)

    kernel = functools.partial(
        _encoder_kernel, seq_len=seq_len, batch=batch,
        rnn_hidden=H, merge_sum=merge_sum)

    kernel_args = [x_flat] + list(fused_params)
    vmem = lambda: pl.BlockSpec(memory_space=pltpu.MemorySpace.VMEM)

    # TODO(synk): for batch >= 16 on v7x, add a leading batch grid axis (block a
    # multiple of 8 sublanes) marked "parallel" to use both TensorCores; at the
    # demo batch=2 a grid would be a no-op, so the call stays grid-less.
    out_flat = pl.pallas_call(
        kernel,
        out_shape=jax.ShapeDtypeStruct((seq_len * batch, out_dim), jnp.float32),
        in_specs=[vmem() for _ in kernel_args],
        out_specs=vmem(),
        scratch_shapes=[pltpu.VMEM((seq_len * batch, 2 * H), jnp.float32)],
    )(*kernel_args)

    output = out_flat.reshape(seq_len, batch, out_dim)
    token_out = output[-1]
    token_context = output
    return token_out, token_context


# ----------------------------------------------------------------------------
# Deterministic parameter init (matches PyTorch LSTM parameter shapes).
# ----------------------------------------------------------------------------
def make_params(key, num_layers, input_size, rnn_hidden_size):
    params = []
    bound = 1.0 / math.sqrt(rnn_hidden_size)
    for layer in range(num_layers):
        in_dim = input_size if layer == 0 else 2 * rnn_hidden_size
        keys = jax.random.split(jax.random.fold_in(key, layer), 8)
        u = lambda k, shape: jax.random.uniform(
            k, shape, jnp.float32, minval=-bound, maxval=bound)
        params.append({
            # forward direction
            "w_ih_f": u(keys[0], (4 * rnn_hidden_size, in_dim)),
            "w_hh_f": u(keys[1], (4 * rnn_hidden_size, rnn_hidden_size)),
            "b_f":    u(keys[2], (4 * rnn_hidden_size,))
                      + u(keys[3], (4 * rnn_hidden_size,)),   # b_ih + b_hh
            # backward direction
            "w_ih_b": u(keys[4], (4 * rnn_hidden_size, in_dim)),
            "w_hh_b": u(keys[5], (4 * rnn_hidden_size, rnn_hidden_size)),
            "b_b":    u(keys[6], (4 * rnn_hidden_size,))
                      + u(keys[7], (4 * rnn_hidden_size,)),
        })
    return params


# ----------------------------------------------------------------------------
# Pure-JAX reference (lax.scan, raw per-direction weights) for correctness.
# ----------------------------------------------------------------------------
def _lstm_layer_ref(x, w_ih, w_hh, b):
    H = w_hh.shape[1]
    B = x.shape[1]

    def step(carry, x_t):
        h, c = carry
        gates = x_t @ w_ih.T + h @ w_hh.T + b
        i = jax.nn.sigmoid(gates[:, 0 * H:1 * H])
        f = jax.nn.sigmoid(gates[:, 1 * H:2 * H])
        g = jnp.tanh(gates[:, 2 * H:3 * H])
        o = jax.nn.sigmoid(gates[:, 3 * H:4 * H])
        c = f * c + i * g
        h = o * jnp.tanh(c)
        return (h, c), h

    h0 = jnp.zeros((B, H), jnp.float32)
    _, out = lax.scan(step, (h0, h0), x)
    return out


def rnn_encoder_ref(token_embed, params, num_layers, rnn_hidden_size,
                    merge_mode="concat"):
    x = token_embed
    for layer in range(num_layers):
        p = params[layer]
        f = _lstm_layer_ref(x, p["w_ih_f"], p["w_hh_f"], p["b_f"])
        b = _lstm_layer_ref(x[::-1], p["w_ih_b"], p["w_hh_b"], p["b_b"])[::-1]
        x = jnp.concatenate([f, b], axis=-1)
    if merge_mode == "sum":
        s, bt, _ = x.shape
        x = x.reshape(s, bt, 2, rnn_hidden_size).sum(axis=2)
    return x[-1], x


# ----------------------------------------------------------------------------
if __name__ == "__main__":
    # Module config: RNNEncoder(num_layers=2, input_size=16, hidden_size=32,
    #                           merge_mode='concat')  -> rnn_hidden_size = 16
    num_layers = 2
    input_size = 16
    hidden_size = 32
    rnn_hidden_size = hidden_size // 2
    seq_len, batch = 8, 2

    key = jax.random.PRNGKey(0)
    k_x, k_p, k_p2 = jax.random.split(key, 3)
    token_embed = jax.random.normal(k_x, (seq_len, batch, input_size),
                                    dtype=jnp.float32)

    # ------------------ merge_mode = 'concat' ------------------
    params = make_params(k_p, num_layers, input_size, rnn_hidden_size)
    fused = prepare_fused_params(params, rnn_hidden_size)
    fused = [jax.block_until_ready(w) for w in fused]

    fwd = jax.jit(functools.partial(rnn_encoder_forward,
                                    rnn_hidden_size=rnn_hidden_size,
                                    merge_mode="concat"))
    token_out, token_context = fwd(token_embed, fused)
    token_out = jax.block_until_ready(token_out)
    token_context = jax.block_until_ready(token_context)

    assert token_out.shape == (batch, hidden_size)
    assert token_context.shape == (seq_len, batch, hidden_size)

    ref_out, ref_ctx = rnn_encoder_ref(token_embed, params, num_layers,
                                       rnn_hidden_size, "concat")
    assert jnp.allclose(token_out, ref_out, rtol=1e-4, atol=1e-4)
    assert jnp.allclose(token_context, ref_ctx, rtol=1e-4, atol=1e-4)

    # ------------------ merge_mode = 'sum' (in-kernel reduction) ------------------
    sum_hidden = 16                      # 'sum' keeps rnn_hidden_size == hidden_size
    params_s = make_params(k_p2, num_layers, input_size, sum_hidden)
    fused_s = prepare_fused_params(params_s, sum_hidden)
    fwd_s = jax.jit(functools.partial(rnn_encoder_forward,
                                      rnn_hidden_size=sum_hidden,
                                      merge_mode="sum"))
    s_out, s_ctx = fwd_s(token_embed, fused_s)
    s_out = jax.block_until_ready(s_out)
    s_ctx = jax.block_until_ready(s_ctx)

    ref_s_out, ref_s_ctx = rnn_encoder_ref(token_embed, params_s, num_layers,
                                           sum_hidden, "sum")
    assert s_out.shape == (batch, sum_hidden)
    assert jnp.allclose(s_out, ref_s_out, rtol=1e-4, atol=1e-4)
    assert jnp.allclose(s_ctx, ref_s_ctx, rtol=1e-4, atol=1e-4)

    print("KERNEL_OK")
</pallas_src>

<mosaic_0001>
module attributes {stable_mosaic.version = 11 : i64} {
  func.func @_encoder_kernel(%arg0: memref<16x16xf32, #tpu.memory_space<vmem>>, %arg1: memref<16x128xf32, #tpu.memory_space<vmem>>, %arg2: memref<32x128xf32, #tpu.memory_space<vmem>>, %arg3: memref<1x128xf32, #tpu.memory_space<vmem>>, %arg4: memref<32x128xf32, #tpu.memory_space<vmem>>, %arg5: memref<32x128xf32, #tpu.memory_space<vmem>>, %arg6: memref<1x128xf32, #tpu.memory_space<vmem>>, %arg7: memref<16x32xf32, #tpu.memory_space<vmem>>, %arg8: memref<16x32xf32, #tpu.memory_space<vmem>>) attributes {dimension_semantics = [], scalar_prefetch = 0 : i64, scratch_operands = 1 : i64, tpu.core_type = #tpu.core_type<tc>} {
    %0 = tpu.iota {dimensions = array<i32: 1>} : vector<2x128xi32>
    %c16_i32 = arith.constant 16 : i32
    %1 = vector.broadcast %c16_i32 : i32 to vector<2x128xi32>
    %2 = arith.cmpi slt, %0, %1 : vector<2x128xi32>
    %c32_i32 = arith.constant 32 : i32
    %3 = vector.broadcast %c32_i32 : i32 to vector<2x128xi32>
    %4 = arith.cmpi sge, %0, %3 : vector<2x128xi32>
    %c48_i32 = arith.constant 48 : i32
    %5 = vector.broadcast %c48_i32 : i32 to vector<2x128xi32>
    %6 = arith.cmpi slt, %0, %5 : vector<2x128xi32>
    %7 = arith.andi %4, %6 : vector<2x128xi1>
    %8 = arith.ori %2, %7 : vector<2x128xi1>
    %c64_i32 = arith.constant 64 : i32
    %9 = vector.broadcast %c64_i32 : i32 to vector<2x128xi32>
    %10 = arith.cmpi sge, %0, %9 : vector<2x128xi32>
    %c80_i32 = arith.constant 80 : i32
    %11 = vector.broadcast %c80_i32 : i32 to vector<2x128xi32>
    %12 = arith.cmpi slt, %0, %11 : vector<2x128xi32>
    %13 = arith.andi %10, %12 : vector<2x128xi1>
    %14 = arith.ori %8, %13 : vector<2x128xi1>
    %c96_i32 = arith.constant 96 : i32
    %15 = vector.broadcast %c96_i32 : i32 to vector<2x128xi32>
    %16 = arith.cmpi sge, %0, %15 : vector<2x128xi32>
    %c112_i32 = arith.constant 112 : i32
    %17 = vector.broadcast %c112_i32 : i32 to vector<2x128xi32>
    %18 = arith.cmpi slt, %0, %17 : vector<2x128xi32>
    %19 = arith.andi %16, %18 : vector<2x128xi1>
    %20 = arith.ori %14, %19 : vector<2x128xi1>
    %21 = tpu.iota {dimensions = array<i32: 1>} : vector<2x32xi32>
    %c16_i32_0 = arith.constant 16 : i32
    %22 = vector.broadcast %c16_i32_0 : i32 to vector<2x32xi32>
    %23 = arith.cmpi slt, %21, %22 : vector<2x32xi32>
    %c0 = arith.constant 0 : index
    %c0_1 = arith.constant 0 : index
    %24 = vector.load %arg1[%c0, %c0_1] : memref<16x128xf32, #tpu.memory_space<vmem>>, vector<16x128xf32>
    %c0_2 = arith.constant 0 : index
    %c0_3 = arith.constant 0 : index
    %25 = vector.load %arg2[%c0_2, %c0_3] : memref<32x128xf32, #tpu.memory_space<vmem>>, vector<32x128xf32>
    %c0_4 = arith.constant 0 : index
    %c0_5 = arith.constant 0 : index
    %26 = vector.load %arg3[%c0_4, %c0_5] : memref<1x128xf32, #tpu.memory_space<vmem>>, vector<1x128xf32>
    %c0_6 = arith.constant 0 : index
    %c0_7 = arith.constant 0 : index
    %27 = vector.load %arg0[%c0_6, %c0_7] : memref<16x16xf32, #tpu.memory_space<vmem>>, vector<16x16xf32>
    %cst = arith.constant dense<0.000000e+00> : vector<16x128xf32>
    %28 = tpu.matmul %27, %24, %cst {dimension_numbers = #tpu.dot_dimension_numbers<[1], [0], [0], [1], [0, 0, 1, 1], [], []>} : vector<16x16xf32>, vector<16x128xf32>, vector<16x128xf32> -> vector<16x128xf32>
    %29 = vector.broadcast %26 : vector<1x128xf32> to vector<16x128xf32>
    %30 = arith.addf %28, %29 : vector<16x128xf32>
    %31 = vector.extract_strided_slice %30 {offsets = [0, 0], sizes = [2, 128], strides = [1, 1]} : vector<16x128xf32> to vector<2x128xf32>
    %32 = vector.extract_strided_slice %30 {offsets = [2, 0], sizes = [2, 128], strides = [1, 1]} : vector<16x128xf32> to vector<2x128xf32>
    %33 = vector.extract_strided_slice %30 {offsets = [4, 0], sizes = [2, 128], strides = [1, 1]} : vector<16x128xf32> to vector<2x128xf32>
    %34 = vector.extract_strided_slice %30 {offsets = [6, 0], sizes = [2, 128], strides = [1, 1]} : vector<16x128xf32> to vector<2x128xf32>
    %35 = vector.extract_strided_slice %30 {offsets = [8, 0], sizes = [2, 128], strides = [1, 1]} : vector<16x128xf32> to vector<2x128xf32>
    %36 = vector.extract_strided_slice %30 {offsets = [10, 0], sizes = [2, 128], strides = [1, 1]} : vector<16x128xf32> to vector<2x128xf32>
    %37 = vector.extract_strided_slice %30 {offsets = [12, 0], sizes = [2, 128], strides = [1, 1]} : vector<16x128xf32> to vector<2x128xf32>
    %38 = vector.extract_strided_slice %30 {offsets = [14, 0], sizes = [2, 128], strides = [1, 1]} : vector<16x128xf32> to vector<2x128xf32>
    %39 = arith.select %20, %31, %38 : vector<2x128xi1>, vector<2x128xf32>
    %40 = arith.select %20, %32, %37 : vector<2x128xi1>, vector<2x128xf32>
    %41 = arith.select %20, %33, %36 : vector<2x128xi1>, vector<2x128xf32>
    %42 = arith.select %20, %34, %35 : vector<2x128xi1>, vector<2x128xf32>
    %43 = arith.select %20, %35, %34 : vector<2x128xi1>, vector<2x128xf32>
    %44 = arith.select %20, %36, %33 : vector<2x128xi1>, vector<2x128xf32>
    %45 = arith.select %20, %37, %32 : vector<2x128xi1>, vector<2x128xf32>
    %46 = arith.select %20, %38, %31 : vector<2x128xi1>, vector<2x128xf32>
    %47 = arith.negf %39 : vector<2x128xf32>
    %48 = math.exp %47 : vector<2x128xf32>
    %cst_8 = arith.constant 1.000000e+00 : f32
    %49 = vector.broadcast %cst_8 : f32 to vector<2x128xf32>
    %50 = arith.addf %49, %48 : vector<2x128xf32>
    %51 = arith.divf %49, %50 : vector<2x128xf32>
    %52 = math.tanh %39 : vector<2x128xf32>
    %53 = vector.extract_strided_slice %51 {offsets = [0, 0], sizes = [2, 32], strides = [1, 1]} : vector<2x128xf32> to vector<2x32xf32>
    %54 = vector.extract_strided_slice %52 {offsets = [0, 96], sizes = [2, 32], strides = [1, 1]} : vector<2x128xf32> to vector<2x32xf32>
    %55 = arith.mulf %53, %54 : vector<2x32xf32>
    %56 = vector.extract_strided_slice %51 {offsets = [0, 64], sizes = [2, 32], strides = [1, 1]} : vector<2x128xf32> to vector<2x32xf32>
    %57 = math.tanh %55 : vector<2x32xf32>
    %58 = arith.mulf %56, %57 : vector<2x32xf32>
    %cst_9 = arith.constant dense<0.000000e+00> : vector<2x128xf32>
    %59 = tpu.matmul %58, %25, %cst_9 {dimension_numbers = #tpu.dot_dimension_numbers<[1], [0], [0], [1], [0, 0, 1, 1], [], []>} : vector<2x32xf32>, vector<32x128xf32>, vector<2x128xf32> -> vector<2x128xf32>
    %60 = arith.addf %40, %59 : vector<2x128xf32>
    %61 = arith.negf %60 : vector<2x128xf32>
    %62 = math.exp %61 : vector<2x128xf32>
    %cst_10 = arith.constant 1.000000e+00 : f32
    %63 = vector.broadcast %cst_10 : f32 to vector<2x128xf32>
    %64 = arith.addf %63, %62 : vector<2x128xf32>
    %65 = arith.divf %63, %64 : vector<2x128xf32>
    %66 = math.tanh %60 : vector<2x128xf32>
    %67 = vector.extract_strided_slice %65 {offsets = [0, 0], sizes = [2, 32], strides = [1, 1]} : vector<2x128xf32> to vector<2x32xf32>
    %68 = vector.extract_strided_slice %65 {offsets = [0, 32], sizes = [2, 32], strides = [1, 1]} : vector<2x128xf32> to vector<2x32xf32>
    %69 = vector.extract_strided_slice %65 {offsets = [0, 64], sizes = [2, 32], strides = [1, 1]} : vector<2x128xf32> to vector<2x32xf32>
    %70 = vector.extract_strided_slice %66 {offsets = [0, 96], sizes = [2, 32], strides = [1, 1]} : vector<2x128xf32> to vector<2x32xf32>
    %71 = arith.mulf %68, %55 : vector<2x32xf32>
    %72 = arith.mulf %67, %70 : vector<2x32xf32>
    %73 = arith.addf %71, %72 : vector<2x32xf32>
    %74 = math.tanh %73 : vector<2x32xf32>
    %75 = arith.mulf %69, %74 : vector<2x32xf32>
    %cst_11 = arith.constant dense<0.000000e+00> : vector<2x128xf32>
    %76 = tpu.matmul %75, %25, %cst_11 {dimension_numbers = #tpu.dot_dimension_numbers<[1], [0], [0], [1], [0, 0, 1, 1], [], []>} : vector<2x32xf32>, vector<32x128xf32>, vector<2x128xf32> -> vector<2x128xf32>
    %77 = arith.addf %41, %76 : vector<2x128xf32>
    %78 = arith.negf %77 : vector<2x128xf32>
    %79 = math.exp %78 : vector<2x128xf32>
    %cst_12 = arith.constant 1.000000e+00 : f32
    %80 = vector.broadcast %cst_12 : f32 to vector<2x128xf32>
    %81 = arith.addf %80, %79 : vector<2x128xf32>
    %82 = arith.divf %80, %81 : vector<2x128xf32>
    %83 = math.tanh %77 : vector<2x128xf32>
    %84 = vector.extract_strided_slice %82 {offsets = [0, 0], sizes = [2, 32], strides = [1, 1]} : vector<2x128xf32> to vector<2x32xf32>
    %85 = vector.extract_strided_slice %82 {offsets = [0, 32], sizes = [2, 32], strides = [1, 1]} : vector<2x128xf32> to vector<2x32xf32>
    %86 = vector.extract_strided_slice %82 {offsets = [0, 64], sizes = [2, 32], strides = [1, 1]} : vector<2x128xf32> to vector<2x32xf32>
    %87 = vector.extract_strided_slice %83 {offsets = [0, 96], sizes = [2, 32], strides = [1, 1]} : vector<2x128xf32> to vector<2x32xf32>
    %88 = arith.mulf %85, %73 : vector<2x32xf32>
    %89 = arith.mulf %84, %87 : vector<2x32xf32>
    %90 = arith.addf %88, %89 : vector<2x32xf32>
    %91 = math.tanh %90 : vector<2x32xf32>
    %92 = arith.mulf %86, %91 : vector<2x32xf32>
    %cst_13 = arith.constant dense<0.000000e+00> : vector<2x128xf32>
    %93 = tpu.matmul %92, %25, %cst_13 {dimension_numbers = #tpu.dot_dimension_numbers<[1], [0], [0], [1], [0, 0, 1, 1], [], []>} : vector<2x32xf32>, vector<32x128xf32>, vector<2x128xf32> -> vector<2x128xf32>
    %94 = arith.addf %42, %93 : vector<2x128xf32>
    %95 = arith.negf %94 : vector<2x128xf32>
    %96 = math.exp %95 : vector<2x128xf32>
    %cst_14 = arith.constant 1.000000e+00 : f32
    %97 = vector.broadcast %cst_14 : f32 to vector<2x128xf32>
    %98 = arith.addf %97, %96 : vector<2x128xf32>
    %99 = arith.divf %97, %98 : vector<2x128xf32>
    %100 = math.tanh %94 : vector<2x128xf32>
    %101 = vector.extract_strided_slice %99 {offsets = [0, 0], sizes = [2, 32], strides = [1, 1]} : vector<2x128xf32> to vector<2x32xf32>
    %102 = vector.extract_strided_slice %99 {offsets = [0, 32], sizes = [2, 32], strides = [1, 1]} : vector<2x128xf32> to vector<2x32xf32>
    %103 = vector.extract_strided_slice %99 {offsets = [0, 64], sizes = [2, 32], strides = [1, 1]} : vector<2x128xf32> to vector<2x32xf32>
    %104 = vector.extract_strided_slice %100 {offsets = [0, 96], sizes = [2, 32], strides = [1, 1]} : vector<2x128xf32> to vector<2x32xf32>
    %105 = arith.mulf %102, %90 : vector<2x32xf32>
    %106 = arith.mulf %101, %104 : vector<2x32xf32>
    %107 = arith.addf %105, %106 : vector<2x32xf32>
    %108 = math.tanh %107 : vector<2x32xf32>
    %109 = arith.mulf %103, %108 : vector<2x32xf32>
    %cst_15 = arith.constant dense<0.000000e+00> : vector<2x128xf32>
    %110 = tpu.matmul %109, %25, %cst_15 {dimension_numbers = #tpu.dot_dimension_numbers<[1], [0], [0], [1], [0, 0, 1, 1], [], []>} : vector<2x32xf32>, vector<32x128xf32>, vector<2x128xf32> -> vector<2x128xf32>
    %111 = arith.addf %43, %110 : vector<2x128xf32>
    %112 = arith.negf %111 : vector<2x128xf32>
    %113 = math.exp %112 : vector<2x128xf32>
    %cst_16 = arith.constant 1.000000e+00 : f32
    %114 = vector.broadcast %cst_16 : f32 to vector<2x128xf32>
    %115 = arith.addf %114, %113 : vector<2x128xf32>
    %116 = arith.divf %114, %115 : vector<2x128xf32>
    %117 = math.tanh %111 : vector<2x128xf32>
    %118 = vector.extract_strided_slice %116 {offsets = [0, 0], sizes = [2, 32], strides = [1, 1]} : vector<2x128xf32> to vector<2x32xf32>
    %119 = vector.extract_strided_slice %116 {offsets = [0, 32], sizes = [2, 32], strides = [1, 1]} : vector<2x128xf32> to vector<2x32xf32>
    %120 = vector.extract_strided_slice %116 {offsets = [0, 64], sizes = [2, 32], strides = [1, 1]} : vector<2x128xf32> to vector<2x32xf32>
    %121 = vector.extract_strided_slice %117 {offsets = [0, 96], sizes = [2, 32], strides = [1, 1]} : vector<2x128xf32> to vector<2x32xf32>
    %122 = arith.mulf %119, %107 : vector<2x32xf32>
    %123 = arith.mulf %118, %121 : vector<2x32xf32>
    %124 = arith.addf %122, %123 : vector<2x32xf32>
    %125 = math.tanh %124 : vector<2x32xf32>
    %126 = arith.mulf %120, %125 : vector<2x32xf32>
    %cst_17 = arith.constant dense<0.000000e+00> : vector<2x128xf32>
    %127 = tpu.matmul %126, %25, %cst_17 {dimension_numbers = #tpu.dot_dimension_numbers<[1], [0], [0], [1], [0, 0, 1, 1], [], []>} : vector<2x32xf32>, vector<32x128xf32>, vector<2x128xf32> -> vector<2x128xf32>
    %128 = arith.addf %44, %127 : vector<2x128xf32>
    %129 = arith.negf %128 : vector<2x128xf32>
    %130 = math.exp %129 : vector<2x128xf32>
    %cst_18 = arith.constant 1.000000e+00 : f32
    %131 = vector.broadcast %cst_18 : f32 to vector<2x128xf32>
    %132 = arith.addf %131, %130 : vector<2x128xf32>
    %133 = arith.divf %131, %132 : vector<2x128xf32>
    %134 = math.tanh %128 : vector<2x128xf32>
    %135 = vector.extract_strided_slice %133 {offsets = [0, 0], sizes = [2, 32], strides = [1, 1]} : vector<2x128xf32> to vector<2x32xf32>
    %136 = vector.extract_strided_slice %133 {offsets = [0, 32], sizes = [2, 32], strides = [1, 1]} : vector<2x128xf32> to vector<2x32xf32>
    %137 = vector.extract_strided_slice %133 {offsets = [0, 64], sizes = [2, 32], strides = [1, 1]} : vector<2x128xf32> to vector<2x32xf32>
    %138 = vector.extract_strided_slice %134 {offsets = [0, 96], sizes = [2, 32], strides = [1, 1]} : vector<2x128xf32> to vector<2x32xf32>
    %139 = arith.mulf %136, %124 : vector<2x32xf32>
    %140 = arith.mulf %135, %138 : vector<2x32xf32>
    %141 = arith.addf %139, %140 : vector<2x32xf32>
    %142 = math.tanh %141 : vector<2x32xf32>
    %143 = arith.mulf %137, %142 : vector<2x32xf32>
    %cst_19 = arith.constant dense<0.000000e+00> : vector<2x128xf32>
    %144 = tpu.matmul %143, %25, %cst_19 {dimension_numbers = #tpu.dot_dimension_numbers<[1], [0], [0], [1], [0, 0, 1, 1], [], []>} : vector<2x32xf32>, vector<32x128xf32>, vector<2x128xf32> -> vector<2x128xf32>
    %145 = arith.addf %45, %144 : vector<2x128xf32>
    %146 = arith.negf %145 : vector<2x128xf32>
    %147 = math.exp %146 : vector<2x128xf32>
    %cst_20 = arith.constant 1.000000e+00 : f32
    %148 = vector.broadcast %cst_20 : f32 to vector<2x128xf32>
    %149 = arith.addf %148, %147 : vector<2x128xf32>
    %150 = arith.divf %148, %149 : vector<2x128xf32>
    %151 = math.tanh %145 : vector<2x128xf32>
    %152 = vector.extract_strided_slice %150 {offsets = [0, 0], sizes = [2, 32], strides = [1, 1]} : vector<2x128xf32> to vector<2x32xf32>
    %153 = vector.extract_strided_slice %150 {offsets = [0, 32], sizes = [2, 32], strides = [1, 1]} : vector<2x128xf32> to vector<2x32xf32>
    %154 = vector.extract_strided_slice %150 {offsets = [0, 64], sizes = [2, 32], strides = [1, 1]} : vector<2x128xf32> to vector<2x32xf32>
    %155 = vector.extract_strided_slice %151 {offsets = [0, 96], sizes = [2, 32], strides = [1, 1]} : vector<2x128xf32> to vector<2x32xf32>
    %156 = arith.mulf %153, %141 : vector<2x32xf32>
    %157 = arith.mulf %152, %155 : vector<2x32xf32>
    %158 = arith.addf %156, %157 : vector<2x32xf32>
    %159 = math.tanh %158 : vector<2x32xf32>
    %160 = arith.mulf %154, %159 : vector<2x32xf32>
    %cst_21 = arith.constant dense<0.000000e+00> : vector<2x128xf32>
    %161 = tpu.matmul %160, %25, %cst_21 {dimension_numbers = #tpu.dot_dimension_numbers<[1], [0], [0], [1], [0, 0, 1, 1], [], []>} : vector<2x32xf32>, vector<32x128xf32>, vector<2x128xf32> -> vector<2x128xf32>
    %162 = arith.addf %46, %161 : vector<2x128xf32>
    %163 = arith.negf %162 : vector<2x128xf32>
    %164 = math.exp %163 : vector<2x128xf32>
    %cst_22 = arith.constant 1.000000e+00 : f32
    %165 = vector.broadcast %cst_22 : f32 to vector<2x128xf32>
    %166 = arith.addf %165, %164 : vector<2x128xf32>
    %167 = arith.divf %165, %166 : vector<2x128xf32>
    %168 = math.tanh %162 : vector<2x128xf32>
    %169 = vector.extract_strided_slice %167 {offsets = [0, 0], sizes = [2, 32], strides = [1, 1]} : vector<2x128xf32> to vector<2x32xf32>
    %170 = vector.extract_strided_slice %167 {offsets = [0, 32], sizes = [2, 32], strides = [1, 1]} : vector<2x128xf32> to vector<2x32xf32>
    %171 = vector.extract_strided_slice %167 {offsets = [0, 64], sizes = [2, 32], strides = [1, 1]} : vector<2x128xf32> to vector<2x32xf32>
    %172 = vector.extract_strided_slice %168 {offsets = [0, 96], sizes = [2, 32], strides = [1, 1]} : vector<2x128xf32> to vector<2x32xf32>
    %173 = arith.mulf %170, %158 : vector<2x32xf32>
    %174 = arith.mulf %169, %172 : vector<2x32xf32>
    %175 = arith.addf %173, %174 : vector<2x32xf32>
    %176 = math.tanh %175 : vector<2x32xf32>
    %177 = arith.mulf %171, %176 : vector<2x32xf32>
    %178 = arith.select %23, %58, %177 : vector<2x32xi1>, vector<2x32xf32>
    %c0_23 = arith.constant 0 : index
    %c0_24 = arith.constant 0 : index
    %179 = vector.load %arg8[%c0_23, %c0_24] : memref<16x32xf32, #tpu.memory_space<vmem>>, vector<2x32xf32>
    tpu.vector_store %arg8[%c0_23, %c0_24], %178 {strides = array<i32>} : memref<16x32xf32, #tpu.memory_space<vmem>>, vector<2x32xf32>,
    %180 = arith.select %23, %75, %160 : vector<2x32xi1>, vector<2x32xf32>
    %c2 = arith.constant 2 : index
    %c0_25 = arith.constant 0 : index
    %181 = vector.load %arg8[%c2, %c0_25] : memref<16x32xf32, #tpu.memory_space<vmem>>, vector<2x32xf32>
    tpu.vector_store %arg8[%c2, %c0_25], %180 {strides = array<i32>} : memref<16x32xf32, #tpu.memory_space<vmem>>, vector<2x32xf32>,
    %182 = arith.select %23, %92, %143 : vector<2x32xi1>, vector<2x32xf32>
    %c4 = arith.constant 4 : index
    %c0_26 = arith.constant 0 : index
    %183 = vector.load %arg8[%c4, %c0_26] : memref<16x32xf32, #tpu.memory_space<vmem>>, vector<2x32xf32>
    tpu.vector_store %arg8[%c4, %c0_26], %182 {strides = array<i32>} : memref<16x32xf32, #tpu.memory_space<vmem>>, vector<2x32xf32>,
    %184 = arith.select %23, %109, %126 : vector<2x32xi1>, vector<2x32xf32>
    %c6 = arith.constant 6 : index
    %c0_27 = arith.constant 0 : index
    %185 = vector.load %arg8[%c6, %c0_27] : memref<16x32xf32, #tpu.memory_space<vmem>>, vector<2x32xf32>
    tpu.vector_store %arg8[%c6, %c0_27], %184 {strides = array<i32>} : memref<16x32xf32, #tpu.memory_space<vmem>>, vector<2x32xf32>,
    %186 = arith.select %23, %126, %109 : vector<2x32xi1>, vector<2x32xf32>
    %c8 = arith.constant 8 : index
    %c0_28 = arith.constant 0 : index
    %187 = vector.load %arg8[%c8, %c0_28] : memref<16x32xf32, #tpu.memory_space<vmem>>, vector<2x32xf32>
    tpu.vector_store %arg8[%c8, %c0_28], %186 {strides = array<i32>} : memref<16x32xf32, #tpu.memory_space<vmem>>, vector<2x32xf32>,
    %188 = arith.select %23, %143, %92 : vector<2x32xi1>, vector<2x32xf32>
    %c10 = arith.constant 10 : index
    %c0_29 = arith.constant 0 : index
    %189 = vector.load %arg8[%c10, %c0_29] : memref<16x32xf32, #tpu.memory_space<vmem>>, vector<2x32xf32>
    tpu.vector_store %arg8[%c10, %c0_29], %188 {strides = array<i32>} : memref<16x32xf32, #tpu.memory_space<vmem>>, vector<2x32xf32>,
    %190 = arith.select %23, %160, %75 : vector<2x32xi1>, vector<2x32xf32>
    %c12 = arith.constant 12 : index
    %c0_30 = arith.constant 0 : index
    %191 = vector.load %arg8[%c12, %c0_30] : memref<16x32xf32, #tpu.memory_space<vmem>>, vector<2x32xf32>
    tpu.vector_store %arg8[%c12, %c0_30], %190 {strides = array<i32>} : memref<16x32xf32, #tpu.memory_space<vmem>>, vector<2x32xf32>,
    %192 = arith.select %23, %177, %58 : vector<2x32xi1>, vector<2x32xf32>
    %c14 = arith.constant 14 : index
    %c0_31 = arith.constant 0 : index
    %193 = vector.load %arg8[%c14, %c0_31] : memref<16x32xf32, #tpu.memory_space<vmem>>, vector<2x32xf32>
    tpu.vector_store %arg8[%c14, %c0_31], %192 {strides = array<i32>} : memref<16x32xf32, #tpu.memory_space<vmem>>, vector<2x32xf32>,
    %c0_32 = arith.constant 0 : index
    %c0_33 = arith.constant 0 : index
    %194 = vector.load %arg4[%c0_32, %c0_33] : memref<32x128xf32, #tpu.memory_space<vmem>>, vector<32x128xf32>
    %c0_34 = arith.constant 0 : index
    %c0_35 = arith.constant 0 : index
    %195 = vector.load %arg5[%c0_34, %c0_35] : memref<32x128xf32, #tpu.memory_space<vmem>>, vector<32x128xf32>
    %c0_36 = arith.constant 0 : index
    %c0_37 = arith.constant 0 : index
    %196 = vector.load %arg6[%c0_36, %c0_37] : memref<1x128xf32, #tpu.memory_space<vmem>>, vector<1x128xf32>
    %c0_38 = arith.constant 0 : index
    %c0_39 = arith.constant 0 : index
    %197 = vector.load %arg8[%c0_38, %c0_39] : memref<16x32xf32, #tpu.memory_space<vmem>>, vector<16x32xf32>
    %cst_40 = arith.constant dense<0.000000e+00> : vector<16x128xf32>
    %198 = tpu.matmul %197, %194, %cst_40 {dimension_numbers = #tpu.dot_dimension_numbers<[1], [0], [0], [1], [0, 0, 1, 1], [], []>} : vector<16x32xf32>, vector<32x128xf32>, vector<16x128xf32> -> vector<16x128xf32>
    %199 = vector.broadcast %196 : vector<1x128xf32> to vector<16x128xf32>
    %200 = arith.addf %198, %199 : vector<16x128xf32>
    %201 = vector.extract_strided_slice %200 {offsets = [0, 0], sizes = [2, 128], strides = [1, 1]} : vector<16x128xf32> to vector<2x128xf32>
    %202 = vector.extract_strided_slice %200 {offsets = [2, 0], sizes = [2, 128], strides = [1, 1]} : vector<16x128xf32> to vector<2x128xf32>
    %203 = vector.extract_strided_slice %200 {offsets = [4, 0], sizes = [2, 128], strides = [1, 1]} : vector<16x128xf32> to vector<2x128xf32>
    %204 = vector.extract_strided_slice %200 {offsets = [6, 0], sizes = [2, 128], strides = [1, 1]} : vector<16x128xf32> to vector<2x128xf32>
    %205 = vector.extract_strided_slice %200 {offsets = [8, 0], sizes = [2, 128], strides = [1, 1]} : vector<16x128xf32> to vector<2x128xf32>
    %206 = vector.extract_strided_slice %200 {offsets = [10, 0], sizes = [2, 128], strides = [1, 1]} : vector<16x128xf32> to vector<2x128xf32>
    %207 = vector.extract_strided_slice %200 {offsets = [12, 0], sizes = [2, 128], strides = [1, 1]} : vector<16x128xf32> to vector<2x128xf32>
    %208 = vector.extract_strided_slice %200 {offsets = [14, 0], sizes = [2, 128], strides = [1, 1]} : vector<16x128xf32> to vector<2x128xf32>
    %209 = arith.select %20, %201, %208 : vector<2x128xi1>, vector<2x128xf32>
    %210 = arith.select %20, %202, %207 : vector<2x128xi1>, vector<2x128xf32>
    %211 = arith.select %20, %203, %206 : vector<2x128xi1>, vector<2x128xf32>
    %212 = arith.select %20, %204, %205 : vector<2x128xi1>, vector<2x128xf32>
    %213 = arith.select %20, %205, %204 : vector<2x128xi1>, vector<2x128xf32>
    %214 = arith.select %20, %206, %203 : vector<2x128xi1>, vector<2x128xf32>
    %215 = arith.select %20, %207, %202 : vector<2x128xi1>, vector<2x128xf32>
    %216 = arith.select %20, %208, %201 : vector<2x128xi1>, vector<2x128xf32>
    %217 = arith.negf %209 : vector<2x128xf32>
    %218 = math.exp %217 : vector<2x128xf32>
    %cst_41 = arith.constant 1.000000e+00 : f32
    %219 = vector.broadcast %cst_41 : f32 to vector<2x128xf32>
    %220 = arith.addf %219, %218 : vector<2x128xf32>
    %221 = arith.divf %219, %220 : vector<2x128xf32>
    %222 = math.tanh %209 : vector<2x128xf32>
    %223 = vector.extract_strided_slice %221 {offsets = [0, 0], sizes = [2, 32], strides = [1, 1]} : vector<2x128xf32> to vector<2x32xf32>
    %224 = vector.extract_strided_slice %222 {offsets = [0, 96], sizes = [2, 32], strides = [1, 1]} : vector<2x128xf32> to vector<2x32xf32>
    %225 = arith.mulf %223, %224 : vector<2x32xf32>
    %226 = vector.extract_strided_slice %221 {offsets = [0, 64], sizes = [2, 32], strides = [1, 1]} : vector<2x128xf32> to vector<2x32xf32>
    %227 = math.tanh %225 : vector<2x32xf32>
    %228 = arith.mulf %226, %227 : vector<2x32xf32>
    %cst_42 = arith.constant dense<0.000000e+00> : vector<2x128xf32>
    %229 = tpu.matmul %228, %195, %cst_42 {dimension_numbers = #tpu.dot_dimension_numbers<[1], [0], [0], [1], [0, 0, 1, 1], [], []>} : vector<2x32xf32>, vector<32x128xf32>, vector<2x128xf32> -> vector<2x128xf32>
    %230 = arith.addf %210, %229 : vector<2x128xf32>
    %231 = arith.negf %230 : vector<2x128xf32>
    %232 = math.exp %231 : vector<2x128xf32>
    %cst_43 = arith.constant 1.000000e+00 : f32
    %233 = vector.broadcast %cst_43 : f32 to vector<2x128xf32>
    %234 = arith.addf %233, %232 : vector<2x128xf32>
    %235 = arith.divf %233, %234 : vector<2x128xf32>
    %236 = math.tanh %230 : vector<2x128xf32>
    %237 = vector.extract_strided_slice %235 {offsets = [0, 0], sizes = [2, 32], strides = [1, 1]} : vector<2x128xf32> to vector<2x32xf32>
    %238 = vector.extract_strided_slice %235 {offsets = [0, 32], sizes = [2, 32], strides = [1, 1]} : vector<2x128xf32> to vector<2x32xf32>
    %239 = vector.extract_strided_slice %235 {offsets = [0, 64], sizes = [2, 32], strides = [1, 1]} : vector<2x128xf32> to vector<2x32xf32>
    %240 = vector.extract_strided_slice %236 {offsets = [0, 96], sizes = [2, 32], strides = [1, 1]} : vector<2x128xf32> to vector<2x32xf32>
    %241 = arith.mulf %238, %225 : vector<2x32xf32>
    %242 = arith.mulf %237, %240 : vector<2x32xf32>
    %243 = arith.addf %241, %242 : vector<2x32xf32>
    %244 = math.tanh %243 : vector<2x32xf32>
    %245 = arith.mulf %239, %244 : vector<2x32xf32>
    %cst_44 = arith.constant dense<0.000000e+00> : vector<2x128xf32>
    %246 = tpu.matmul %245, %195, %cst_44 {dimension_numbers = #tpu.dot_dimension_numbers<[1], [0], [0], [1], [0, 0, 1, 1], [], []>} : vector<2x32xf32>, vector<32x128xf32>, vector<2x128xf32> -> vector<2x128xf32>
    %247 = arith.addf %211, %246 : vector<2x128xf32>
    %248 = arith.negf %247 : vector<2x128xf32>
    %249 = math.exp %248 : vector<2x128xf32>
    %cst_45 = arith.constant 1.000000e+00 : f32
    %250 = vector.broadcast %cst_45 : f32 to vector<2x128xf32>
    %251 = arith.addf %250, %249 : vector<2x128xf32>
    %252 = arith.divf %250, %251 : vector<2x128xf32>
    %253 = math.tanh %247 : vector<2x128xf32>
    %254 = vector.extract_strided_slice %252 {offsets = [0, 0], sizes = [2, 32], strides = [1, 1]} : vector<2x128xf32> to vector<2x32xf32>
    %255 = vector.extract_strided_slice %252 {offsets = [0, 32], sizes = [2, 32], strides = [1, 1]} : vector<2x128xf32> to vector<2x32xf32>
    %256 = vector.extract_strided_slice %252 {offsets = [0, 64], sizes = [2, 32], strides = [1, 1]} : vector<2x128xf32> to vector<2x32xf32>
    %257 = vector.extract_strided_slice %253 {offsets = [0, 96], sizes = [2, 32], strides = [1, 1]} : vector<2x128xf32> to vector<2x32xf32>
    %258 = arith.mulf %255, %243 : vector<2x32xf32>
    %259 = arith.mulf %254, %257 : vector<2x32xf32>
    %260 = arith.addf %258, %259 : vector<2x32xf32>
    %261 = math.tanh %260 : vector<2x32xf32>
    %262 = arith.mulf %256, %261 : vector<2x32xf32>
    %cst_46 = arith.constant dense<0.000000e+00> : vector<2x128xf32>
    %263 = tpu.matmul %262, %195, %cst_46 {dimension_numbers = #tpu.dot_dimension_numbers<[1], [0], [0], [1], [0, 0, 1, 1], [], []>} : vector<2x32xf32>, vector<32x128xf32>, vector<2x128xf32> -> vector<2x128xf32>
    %264 = arith.addf %212, %263 : vector<2x128xf32>
    %265 = arith.negf %264 : vector<2x128xf32>
    %266 = math.exp %265 : vector<2x128xf32>
    %cst_47 = arith.constant 1.000000e+00 : f32
    %267 = vector.broadcast %cst_47 : f32 to vector<2x128xf32>
    %268 = arith.addf %267, %266 : vector<2x128xf32>
    %269 = arith.divf %267, %268 : vector<2x128xf32>
    %270 = math.tanh %264 : vector<2x128xf32>
    %271 = vector.extract_strided_slice %269 {offsets = [0, 0], sizes = [2, 32], strides = [1, 1]} : vector<2x128xf32> to vector<2x32xf32>
    %272 = vector.extract_strided_slice %269 {offsets = [0, 32], sizes = [2, 32], strides = [1, 1]} : vector<2x128xf32> to vector<2x32xf32>
    %273 = vector.extract_strided_slice %269 {offsets = [0, 64], sizes = [2, 32], strides = [1, 1]} : vector<2x128xf32> to vector<2x32xf32>
    %274 = vector.extract_strided_slice %270 {offsets = [0, 96], sizes = [2, 32], strides = [1, 1]} : vector<2x128xf32> to vector<2x32xf32>
    %275 = arith.mulf %272, %260 : vector<2x32xf32>
    %276 = arith.mulf %271, %274 : vector<2x32xf32>
    %277 = arith.addf %275, %276 : vector<2x32xf32>
    %278 = math.tanh %277 : vector<2x32xf32>
    %279 = arith.mulf %273, %278 : vector<2x32xf32>
    %cst_48 = arith.constant dense<0.000000e+00> : vector<2x128xf32>
    %280 = tpu.matmul %279, %195, %cst_48 {dimension_numbers = #tpu.dot_dimension_numbers<[1], [0], [0], [1], [0, 0, 1, 1], [], []>} : vector<2x32xf32>, vector<32x128xf32>, vector<2x128xf32> -> vector<2x128xf32>
    %281 = arith.addf %213, %280 : vector<2x128xf32>
    %282 = arith.negf %281 : vector<2x128xf32>
    %283 = math.exp %282 : vector<2x128xf32>
    %cst_49 = arith.constant 1.000000e+00 : f32
    %284 = vector.broadcast %cst_49 : f32 to vector<2x128xf32>
    %285 = arith.addf %284, %283 : vector<2x128xf32>
    %286 = arith.divf %284, %285 : vector<2x128xf32>
    %287 = math.tanh %281 : vector<2x128xf32>
    %288 = vector.extract_strided_slice %286 {offsets = [0, 0], sizes = [2, 32], strides = [1, 1]} : vector<2x128xf32> to vector<2x32xf32>
    %289 = vector.extract_strided_slice %286 {offsets = [0, 32], sizes = [2, 32], strides = [1, 1]} : vector<2x128xf32> to vector<2x32xf32>
    %290 = vector.extract_strided_slice %286 {offsets = [0, 64], sizes = [2, 32], strides = [1, 1]} : vector<2x128xf32> to vector<2x32xf32>
    %291 = vector.extract_strided_slice %287 {offsets = [0, 96], sizes = [2, 32], strides = [1, 1]} : vector<2x128xf32> to vector<2x32xf32>
    %292 = arith.mulf %289, %277 : vector<2x32xf32>
    %293 = arith.mulf %288, %291 : vector<2x32xf32>
    %294 = arith.addf %292, %293 : vector<2x32xf32>
    %295 = math.tanh %294 : vector<2x32xf32>
    %296 = arith.mulf %290, %295 : vector<2x32xf32>
    %cst_50 = arith.constant dense<0.000000e+00> : vector<2x128xf32>
    %297 = tpu.matmul %296, %195, %cst_50 {dimension_numbers = #tpu.dot_dimension_numbers<[1], [0], [0], [1], [0, 0, 1, 1], [], []>} : vector<2x32xf32>, vector<32x128xf32>, vector<2x128xf32> -> vector<2x128xf32>
    %298 = arith.addf %214, %297 : vector<2x128xf32>
    %299 = arith.negf %298 : vector<2x128xf32>
    %300 = math.exp %299 : vector<2x128xf32>
    %cst_51 = arith.constant 1.000000e+00 : f32
    %301 = vector.broadcast %cst_51 : f32 to vector<2x128xf32>
    %302 = arith.addf %301, %300 : vector<2x128xf32>
    %303 = arith.divf %301, %302 : vector<2x128xf32>
    %304 = math.tanh %298 : vector<2x128xf32>
    %305 = vector.extract_strided_slice %303 {offsets = [0, 0], sizes = [2, 32], strides = [1, 1]} : vector<2x128xf32> to vector<2x32xf32>
    %306 = vector.extract_strided_slice %303 {offsets = [0, 32], sizes = [2, 32], strides = [1, 1]} : vector<2x128xf32> to vector<2x32xf32>
    %307 = vector.extract_strided_slice %303 {offsets = [0, 64], sizes = [2, 32], strides = [1, 1]} : vector<2x128xf32> to vector<2x32xf32>
    %308 = vector.extract_strided_slice %304 {offsets = [0, 96], sizes = [2, 32], strides = [1, 1]} : vector<2x128xf32> to vector<2x32xf32>
    %309 = arith.mulf %306, %294 : vector<2x32xf32>
    %310 = arith.mulf %305, %308 : vector<2x32xf32>
    %311 = arith.addf %309, %310 : vector<2x32xf32>
    %312 = math.tanh %311 : vector<2x32xf32>
    %313 = arith.mulf %307, %312 : vector<2x32xf32>
    %cst_52 = arith.constant dense<0.000000e+00> : vector<2x128xf32>
    %314 = tpu.matmul %313, %195, %cst_52 {dimension_numbers = #tpu.dot_dimension_numbers<[1], [0], [0], [1], [0, 0, 1, 1], [], []>} : vector<2x32xf32>, vector<32x128xf32>, vector<2x128xf32> -> vector<2x128xf32>
    %315 = arith.addf %215, %314 : vector<2x128xf32>
    %316 = arith.negf %315 : vector<2x128xf32>
    %317 = math.exp %316 : vector<2x128xf32>
    %cst_53 = arith.constant 1.000000e+00 : f32
    %318 = vector.broadcast %cst_53 : f32 to vector<2x128xf32>
    %319 = arith.addf %318, %317 : vector<2x128xf32>
    %320 = arith.divf %318, %319 : vector<2x128xf32>
    %321 = math.tanh %315 : vector<2x128xf32>
    %322 = vector.extract_strided_slice %320 {offsets = [0, 0], sizes = [2, 32], strides = [1, 1]} : vector<2x128xf32> to vector<2x32xf32>
    %323 = vector.extract_strided_slice %320 {offsets = [0, 32], sizes = [2, 32], strides = [1, 1]} : vector<2x128xf32> to vector<2x32xf32>
    %324 = vector.extract_strided_slice %320 {offsets = [0, 64], sizes = [2, 32], strides = [1, 1]} : vector<2x128xf32> to vector<2x32xf32>
    %325 = vector.extract_strided_slice %321 {offsets = [0, 96], sizes = [2, 32], strides = [1, 1]} : vector<2x128xf32> to vector<2x32xf32>
    %326 = arith.mulf %323, %311 : vector<2x32xf32>
    %327 = arith.mulf %322, %325 : vector<2x32xf32>
    %328 = arith.addf %326, %327 : vector<2x32xf32>
    %329 = math.tanh %328 : vector<2x32xf32>
    %330 = arith.mulf %324, %329 : vector<2x32xf32>
    %cst_54 = arith.constant dense<0.000000e+00> : vector<2x128xf32>
    %331 = tpu.matmul %330, %195, %cst_54 {dimension_numbers = #tpu.dot_dimension_numbers<[1], [0], [0], [1], [0, 0, 1, 1], [], []>} : vector<2x32xf32>, vector<32x128xf32>, vector<2x128xf32> -> vector<2x128xf32>
    %332 = arith.addf %216, %331 : vector<2x128xf32>
    %333 = arith.negf %332 : vector<2x128xf32>
    %334 = math.exp %333 : vector<2x128xf32>
    %cst_55 = arith.constant 1.000000e+00 : f32
    %335 = vector.broadcast %cst_55 : f32 to vector<2x128xf32>
    %336 = arith.addf %335, %334 : vector<2x128xf32>
    %337 = arith.divf %335, %336 : vector<2x128xf32>
    %338 = math.tanh %332 : vector<2x128xf32>
    %339 = vector.extract_strided_slice %337 {offsets = [0, 0], sizes = [2, 32], strides = [1, 1]} : vector<2x128xf32> to vector<2x32xf32>
    %340 = vector.extract_strided_slice %337 {offsets = [0, 32], sizes = [2, 32], strides = [1, 1]} : vector<2x128xf32> to vector<2x32xf32>
    %341 = vector.extract_strided_slice %337 {offsets = [0, 64], sizes = [2, 32], strides = [1, 1]} : vector<2x128xf32> to vector<2x32xf32>
    %342 = vector.extract_strided_slice %338 {offsets = [0, 96], sizes = [2, 32], strides = [1, 1]} : vector<2x128xf32> to vector<2x32xf32>
    %343 = arith.mulf %340, %328 : vector<2x32xf32>
    %344 = arith.mulf %339, %342 : vector<2x32xf32>
    %345 = arith.addf %343, %344 : vector<2x32xf32>
    %346 = math.tanh %345 : vector<2x32xf32>
    %347 = arith.mulf %341, %346 : vector<2x32xf32>
    %348 = arith.select %23, %228, %347 : vector<2x32xi1>, vector<2x32xf32>
    %c0_56 = arith.constant 0 : index
    %c0_57 = arith.constant 0 : index
    %349 = vector.load %arg7[%c0_56, %c0_57] : memref<16x32xf32, #tpu.memory_space<vmem>>, vector<2x32xf32>
    tpu.vector_store %arg7[%c0_56, %c0_57], %348 {strides = array<i32>} : memref<16x32xf32, #tpu.memory_space<vmem>>, vector<2x32xf32>,
    %350 = arith.select %23, %245, %330 : vector<2x32xi1>, vector<2x32xf32>
    %c2_58 = arith.constant 2 : index
    %c0_59 = arith.constant 0 : index
    %351 = vector.load %arg7[%c2_58, %c0_59] : memref<16x32xf32, #tpu.memory_space<vmem>>, vector<2x32xf32>
    tpu.vector_store %arg7[%c2_58, %c0_59], %350 {strides = array<i32>} : memref<16x32xf32, #tpu.memory_space<vmem>>, vector<2x32xf32>,
    %352 = arith.select %23, %262, %313 : vector<2x32xi1>, vector<2x32xf32>
    %c4_60 = arith.constant 4 : index
    %c0_61 = arith.constant 0 : index
    %353 = vector.load %arg7[%c4_60, %c0_61] : memref<16x32xf32, #tpu.memory_space<vmem>>, vector<2x32xf32>
    tpu.vector_store %arg7[%c4_60, %c0_61], %352 {strides = array<i32>} : memref<16x32xf32, #tpu.memory_space<vmem>>, vector<2x32xf32>,
    %354 = arith.select %23, %279, %296 : vector<2x32xi1>, vector<2x32xf32>
    %c6_62 = arith.constant 6 : index
    %c0_63 = arith.constant 0 : index
    %355 = vector.load %arg7[%c6_62, %c0_63] : memref<16x32xf32, #tpu.memory_space<vmem>>, vector<2x32xf32>
    tpu.vector_store %arg7[%c6_62, %c0_63], %354 {strides = array<i32>} : memref<16x32xf32, #tpu.memory_space<vmem>>, vector<2x32xf32>,
    %356 = arith.select %23, %296, %279 : vector<2x32xi1>, vector<2x32xf32>
    %c8_64 = arith.constant 8 : index
    %c0_65 = arith.constant 0 : index
    %357 = vector.load %arg7[%c8_64, %c0_65] : memref<16x32xf32, #tpu.memory_space<vmem>>, vector<2x32xf32>
    tpu.vector_store %arg7[%c8_64, %c0_65], %356 {strides = array<i32>} : memref<16x32xf32, #tpu.memory_space<vmem>>, vector<2x32xf32>,
    %358 = arith.select %23, %313, %262 : vector<2x32xi1>, vector<2x32xf32>
    %c10_66 = arith.constant 10 : index
    %c0_67 = arith.constant 0 : index
    %359 = vector.load %arg7[%c10_66, %c0_67] : memref<16x32xf32, #tpu.memory_space<vmem>>, vector<2x32xf32>
    tpu.vector_store %arg7[%c10_66, %c0_67], %358 {strides = array<i32>} : memref<16x32xf32, #tpu.memory_space<vmem>>, vector<2x32xf32>,
    %360 = arith.select %23, %330, %245 : vector<2x32xi1>, vector<2x32xf32>
    %c12_68 = arith.constant 12 : index
    %c0_69 = arith.constant 0 : index
    %361 = vector.load %arg7[%c12_68, %c0_69] : memref<16x32xf32, #tpu.memory_space<vmem>>, vector<2x32xf32>
    tpu.vector_store %arg7[%c12_68, %c0_69], %360 {strides = array<i32>} : memref<16x32xf32, #tpu.memory_space<vmem>>, vector<2x32xf32>,
    %362 = arith.select %23, %347, %228 : vector<2x32xi1>, vector<2x32xf32>
    %c14_70 = arith.constant 14 : index
    %c0_71 = arith.constant 0 : index
    %363 = vector.load %arg7[%c14_70, %c0_71] : memref<16x32xf32, #tpu.memory_space<vmem>>, vector<2x32xf32>
    tpu.vector_store %arg7[%c14_70, %c0_71], %362 {strides = array<i32>} : memref<16x32xf32, #tpu.memory_space<vmem>>, vector<2x32xf32>,
    return
  }
}

</mosaic_0001>

<bundles_post_ra>
// kernel: rnn_encoder_forward.1
= control target key start
LH: loop header
LB: loop body
LE: loop exit
PB: predicated region body
PF: predicated region fallthrough
CT: control target
= control target key end

     0   :  { %12 = vsyncpa [#allocation4], 0  ;;  %s3051_s0 = inlined_call_operand.hbm [shape: f32[16,16], index: 0, kind: input, shape index: {}]   ;;  %s3052_s1 = inlined_call_operand.hbm [shape: f32[16,128], index: 1, kind: input, shape index: {}]   ;;  %s3053_s2 = inlined_call_operand.hbm [shape: f32[32,128], index: 2, kind: input, shape index: {}]   ;;  %s3054_s3 = inlined_call_operand.vmem [shape: f32[1,128], index: 3, kind: input, shape index: {}]   ;;  %s3055_s4 = inlined_call_operand.hbm [shape: f32[32,128], index: 4, kind: input, shape index: {}]   ;;  %s3056_s5 = inlined_call_operand.hbm [shape: f32[32,128], index: 5, kind: input, shape index: {}]   ;;  %s3057_s6 = inlined_call_operand.vmem [shape: f32[1,128], index: 6, kind: input, shape index: {}]   ;;  %s3058_s7 = inlined_call_operand.vmem [shape: f32[16,32], index: 7, kind: output, shape index: {}]  }
   0x1   :  { %13 = vsyncpa [#allocation6], 0 }
   0x2   :  { %14 = vsyncpa [#allocation9], 0  ;;  %s2565_s24 = smov [#allocation5]   ;;  %s2566_s26 = smov [#allocation8]  }
   0x3   :  { %s32_s25 = sshll.u32 %s2565_s24, 4  ;;  %s58_s27 = sshll.u32 %s2566_s26, 4  ;;  %s33_s25 = int_to_ptr.vmem [resolvable:$true] %s32_s25  ;;  %s2617_s27 = int_to_ptr.vmem [resolvable:$true] %s58_s27 }
   0x4   :  { %s2449_s30 = scalar_lea.hbm %s3052_s1, 256 }
   0x5   :  { %p2450_p0 = scmp.ne.s32.totalorder %s3052_s1, %s2449_s30  ;;  %p2453_p1 = scmp.lt.u32.totalorder %s2449_s30, %s3052_s1 }
   0x7   :  { %p2455_p2 = pnand %p2453_p1, %p2450_p0 }
   0x9   :  { %2458 = shalt.err (!%p2455_p2)
}
   0xa   :  { %s2459_s12 = scalar_lea.vmem %s33_s25, 256  ;;  %p2464_p4 = scmp.lt.s32.totalorder %s33_s25, %s33_s25 }
   0xb   :  { %p2460_p3 = scmp.ne.s32.totalorder %s33_s25, %s2459_s12  ;;  %p2465_p5 = scmp.lt.s32.totalorder %s2459_s12, %s2459_s12 }
   0xd   :  { %p2466_p6 = por %p2465_p5, %p2464_p4 }
   0xf   :  { %p2467_p7 = pnand %p2466_p6, %p2460_p3 }
  0x11   :  { %2470 = shalt.err (!%p2467_p7)
}
  0x12   :  { %s2567_s13 = smov 128   ;;  %s2568_s14 = smov 8  }
  0x13   :  { %38 = dma.hbm_to_vmem [thread:$0]  %s3052_s1, 256, %s33_s25, [#allocation6], %s2567_s13, %s2567_s13, %s2568_s14  }
  0x14   :  { %s2471_s19 = scalar_lea.hbm %s3055_s4, 512 }
  0x15   :  { %p2472_p8 = scmp.ne.s32.totalorder %s3055_s4, %s2471_s19  ;;  %p2475_p9 = scmp.lt.u32.totalorder %s2471_s19, %s3055_s4 }
  0x17   :  { %p2477_p10 = pnand %p2475_p9, %p2472_p8 }
  0x19   :  { %2480 = shalt.err (!%p2477_p10)
}
  0x1a   :  { %s2481_s24 = scalar_lea.vmem %s2617_s27, 512  ;;  %p2486_p12 = scmp.lt.s32.totalorder %s2617_s27, %s2617_s27 }
  0x1b   :  { %p2482_p11 = scmp.ne.s32.totalorder %s2617_s27, %s2481_s24  ;;  %p2487_p13 = scmp.lt.s32.totalorder %s2481_s24, %s2481_s24 }
  0x1d   :  { %p2488_p0 = por %p2487_p13, %p2486_p12 }
  0x1f   :  { %p2489_p1 = pnand %p2488_p0, %p2482_p11 }
  0x21   :  { %2492 = shalt.err (!%p2489_p1)
}
  0x22   :  { %64 = dma.hbm_to_vmem [thread:$0]  %s3055_s4, 512, %s2617_s27, [#allocation9], %s2567_s13, %s2567_s13, %s2568_s14  }
  0x23   :  { %s2569_s26 = smov [#allocation3]   ;;  %s2570_s29 = smov [#allocation7]  }
  0x24   :  { %s20_s28 = sshll.u32 %s2569_s26, 4  ;;  %s44_s30 = sshll.u32 %s2570_s29, 4  ;;  %s21_s28 = int_to_ptr.vmem [resolvable:$true] %s20_s28  ;;  %s2654_s30 = int_to_ptr.vmem [resolvable:$true] %s44_s30 }
  0x25   :  { %s2493_s10 = scalar_lea.hbm %s3051_s0, 256 }
  0x26   :  { %p2494_p2 = scmp.ne.s32.totalorder %s3051_s0, %s2493_s10  ;;  %p2497_p3 = scmp.lt.u32.totalorder %s2493_s10, %s3051_s0 }
  0x28   :  { %p2499_p4 = pnand %p2497_p3, %p2494_p2 }
  0x2a   :  { %2502 = shalt.err (!%p2499_p4)
}
  0x2b   :  { %s2503_s4 = scalar_lea.vmem %s21_s28, 256  ;;  %p2508_p6 = scmp.lt.s32.totalorder %s21_s28, %s21_s28 }
  0x2c   :  { %p2504_p5 = scmp.ne.s32.totalorder %s21_s28, %s2503_s4  ;;  %p2509_p7 = scmp.lt.s32.totalorder %s2503_s4, %s2503_s4 }
  0x2e   :  { %p2510_p8 = por %p2509_p7, %p2508_p6 }
  0x30   :  { %p2511_p9 = pnand %p2510_p8, %p2504_p5 }
  0x32   :  { %2514 = shalt.err (!%p2511_p9)
}
  0x33   :  { %26 = dma.hbm_to_vmem [thread:$0]  %s3051_s0, 256, %s21_s28, [#allocation4], %s2567_s13, %s2567_s13, %s2568_s14  }
  0x34   :  { %s2515_s20 = scalar_lea.hbm %s3053_s2, 512 }
  0x35   :  { %p2516_p10 = scmp.ne.s32.totalorder %s3053_s2, %s2515_s20  ;;  %p2519_p11 = scmp.lt.u32.totalorder %s2515_s20, %s3053_s2 }
  0x37   :  { %p2521_p12 = pnand %p2519_p11, %p2516_p10 }
  0x39   :  { %2524 = shalt.err (!%p2521_p12)
}
  0x3a   :  { %s2525_s1 = scalar_lea.vmem %s2654_s30, 512  ;;  %p2530_p0 = scmp.lt.s32.totalorder %s2654_s30, %s2654_s30 }
  0x3b   :  { %p2526_p13 = scmp.ne.s32.totalorder %s2654_s30, %s2525_s1  ;;  %p2531_p1 = scmp.lt.s32.totalorder %s2525_s1, %s2525_s1 }
  0x3d   :  { %p2532_p2 = por %p2531_p1, %p2530_p0 }
  0x3f   :  { %p2533_p3 = pnand %p2532_p2, %p2526_p13 }
  0x41   :  { %2536 = shalt.err (!%p2533_p3)
}
  0x42   :  { %50 = dma.hbm_to_vmem [thread:$0]  %s3053_s2, 512, %s2654_s30, [#allocation6], %s2567_s13, %s2567_s13, %s2568_s14  }
  0x43   :  { %s2571_s26 = smov [#allocation10]   ;;  %s2537_s9 = scalar_lea.hbm %s3056_s5, 512 }
  0x44   :  { %s70_s28 = sshll.u32 %s2571_s26, 4  ;;  %p2538_p4 = scmp.ne.s32.totalorder %s3056_s5, %s2537_s9  ;;  %s71_s28 = int_to_ptr.vmem [resolvable:$true] %s70_s28 }
  0x45   :  { %p2541_p5 = scmp.lt.u32.totalorder %s2537_s9, %s3056_s5 }
  0x47   :  { %p2543_p6 = pnand %p2541_p5, %p2538_p4 }
  0x49   :  { %2546 = shalt.err (!%p2543_p6)
}
  0x4a   :  { %s2547_s16 = scalar_lea.vmem %s71_s28, 512  ;;  %p2552_p8 = scmp.lt.s32.totalorder %s71_s28, %s71_s28 }
  0x4b   :  { %p2548_p7 = scmp.ne.s32.totalorder %s71_s28, %s2547_s16  ;;  %p2553_p9 = scmp.lt.s32.totalorder %s2547_s16, %s2547_s16 }
  0x4d   :  { %p2554_p10 = por %p2553_p9, %p2552_p8 }
  0x4f   :  { %p2555_p11 = pnand %p2554_p10, %p2548_p7 }
  0x51   :  { %2558 = shalt.err (!%p2555_p11)
}
  0x52   :  { %76 = dma.hbm_to_vmem [thread:$0]  %s3056_s5, 512, %s71_s28, [#allocation9], %s2567_s13, %s2567_s13, %s2568_s14  }
  0x53   :  { %2559 = dma.done.wait [#allocation4], 256  }
  0x54   :  { %2560 = vsyncadd [#allocation4], 4294967040 }
  0x55   :  { %2561 = dma.done.wait [#allocation6], 768  }
  0x56   :  { %2562 = vsyncadd [#allocation6], 4294966528 }
  0x57   :  { %2563 = dma.done.wait [#allocation9], 1024  }
  0x58   :  { %2564 = vsyncadd [#allocation9], 4294966272  ;;  %vm124_vm0 = vcmask 130048   ;;  %v109_v0 = vld [vmem:[#allocation5] sm:$0xff]  ;;  %v110_v1 = vld [vmem:[#allocation5 + $0x8] sm:$0xff]  ;;  %v94_v5 = vlaneseq  ;;  %v2573_v31 = vmov 0.0|0.0  }
  0x59   :  { %v116_v2 = vld [vmem:[#allocation3] sm:$0xff]  ;;  %v2213_v3 = vpack.c.bf16 %v110_v1, %v109_v0  ;;  %v117_v4 = vld [vmem:[#allocation3 + $0x8] sm:$0xff]  ;;  %v1925_v7 = vld [vmem:[%s3054_s3] ss:$0 sm:$0xff]  ;;  %s2572_s3 = smov 32   ;;  %2217 = vmatprep.subr.bf16.mxu1 %v2573_v31  ;;  %vm2574_vm14 = vmmov 0  }
  0x5a   :  { %2045 = vmatprep.mubr.msk.f32.mxu0 %vm124_vm0, %v116_v2  ;;  %v2706_v6 = vand.u32 127, %v94_v5  ;;  %v111_v28 = vld [vmem:[#allocation7] sm:$0xff]  ;;  %v112_v29 = vld [vmem:[#allocation7 + $0x8] sm:$0xff]  ;;  %v113_v30 = vld [vmem:[#allocation7 + $0x10] sm:$0xff]  ;;  %v2575_v34 = vmov 0.0   ;;  %s2576_s14 = smov 64  }
  0x5b   :  { %2214 = vmatprep.subr.bf16.mxu0 %v2213_v3  ;;  %v2744_v32 = vpack.c.bf16 %v112_v29, %v111_v28  ;;  %v114_v33 = vld [vmem:[#allocation7 + $0x18] sm:$0xff]  ;;  %2056 = vmatprep.mubr.msk.f32.mxu1 %vm2574_vm14, %v2575_v34  ;;  %vm241_vm15 = vcmask 261120  }
  0x5c   :  { %2216 = vmatpush3.bf16.msra.mxu0 %v2213_v3  ;;  %vm97_vm1 = vcmp.ge.s32.totalorder %v2706_v6, 32  ;;  %vm98_vm2 = vcmp.lt.s32.totalorder %v2706_v6, 48  ;;  %vm96_vm3 = vcmp.lt.s32.totalorder %v2706_v6, 16  ;;  %vm101_vm5 = vcmp.ge.s32.totalorder %v2706_v6, 64  ;;  %v1021_v11 = vld [vmem:[#allocation10 + $0x18] sm:$0xff] }
  0x5d   :  { %vm99_vm4 = vmand %vm97_vm1, %vm98_vm2  ;;  %vm102_vm6 = vcmp.lt.s32.totalorder %v2706_v6, 80  ;;  %vm105_vm9 = vcmp.ge.s32.totalorder %v2706_v6, 96  ;;  %vm106_vm10 = vcmp.lt.s32.totalorder %v2706_v6, 112  ;;  %2223 = vmatprep.subr.bf16.mxu0 %v2573_v31  ;;  %2219 = vmatpush3.bf16.msra.mxu1 %v2744_v32  ;;  %v2752_v35 = vpack.c.bf16 %v114_v33, %v113_v30 }
  0x5e   :  { %vm100_vm7 = vmor %vm96_vm3, %vm99_vm4  ;;  %2220 = vmatprep.subr.bf16.mxu1 %v2573_v31 }
  0x5f   :  { %2046 = vmatmul.mubr.msk.f32.vlgmr.msra.gmra.mrb[0].mxu0 %vm124_vm0, %v117_v4  ;;  %vm103_vm8 = vmand %vm101_vm5, %vm102_vm6  ;;  %vm992_vm0 = vcmask 254976  }
  0x60   :  { %vm104_vm11 = vmor %vm100_vm7, %vm103_vm8  ;;  %2067 = vmatprep.mubr.msk.f32.mxu0 %vm2574_vm14, %v2575_v34  ;;  %2225 = vmatpush3.bf16.msra.mxu0 %v2744_v32 }
  0x61   :  { %vm107_vm12 = vmand %vm105_vm9, %vm106_vm10  ;;  %2226 = vmatprep.subr.bf16.mxu0 %v2573_v31  ;;  %2222 = vmatpush3.bf16.msra.mxu1 %v2752_v35 }
  0x62   :  { %vm2720_vm13 = vmor %vm104_vm11, %vm107_vm12  ;;  %2229 = vmatprep.subr.bf16.mxu1 %v2573_v31 }
  0x64   :  { %2228 = vmatpush3.bf16.msra.mxu0 %v2752_v35 }
  0x65   :  { %2235 = vmatprep.subr.bf16.mxu0 %v2573_v31 }
 0x132   :  { %v2047_v8 = vpop.f32.mrb[0].mxu0 }
 0x133   :  { %v203_v9 = vadd.f32 %v2047_v8, %v1925_v7  ;;  %v197_v10 = vpop.f32.mrb[1].mxu0 }
 0x134   :  { %v198_v12 = vadd.f32 %v1925_v7, %v197_v10 }
 0x135   :  { %v207_v13 = vrot.slane %v203_v9, 6  ;;  %v210_v14 = vrot.slane %v203_v9, 2 }
 0x136   :  { %v214_v15 = vrot.slane %v198_v12, 6  ;;  %v217_v16 = vrot.slane %v198_v12, 2 }
 0x137   :  { %v2726_v17 = vsel %vm2720_vm13, %v198_v12, %v207_v13  ;;  %v2730_v18 = vsel %vm2720_vm13, %v198_v12, %v210_v14 }
 0x138   :  { %2321 = vtanh.f32 %v2726_v17  ;;  %v2735_v19 = vsel %vm2720_vm13, %v203_v9, %v214_v15  ;;  %v2739_v20 = vsel %vm2720_vm13, %v203_v9, %v217_v16  ;;  %v1928_v22 = vmul.f32 -1.442695, %v2726_v17 }
 0x13a   :  { %2323 = vpow2.f32 %v1928_v22 }
 0x142   :  { %v2322_v21 = vpop.eup %2321 }
 0x143   :  { %228 = vrot.lane.b32.xlu0 %v2322_v21, %s2572_s3 }
 0x144   :  { %v2324_v23 = vpop.eup %2323 }
 0x145   :  { %v223_v24 = vadd.f32 1.0, %v2324_v23 }
 0x147   :  { %2325 = vrcp.f32 %v223_v24 }
 0x151   :  { %v2326_v25 = vpop.eup %2325 }
 0x1b5   :  { %v229_v26 = vpop.permute.xlu0 %228 }
 0x1b6   :  { %v231_v27 = vmul.f32 %v2326_v25, %v229_v26 }
 0x1b8   :  { %2327 = vtanh.f32 %v231_v27  ;;  %v326_v37 = vrot.slane %v231_v27, 6 }
 0x1c2   :  { %v2328_v36 = vpop.eup %2327 }
 0x1c3   :  { %234 = vrot.lane.b32.xlu0 %v2328_v36, %s2576_s14 }
 0x1c7   :  { %327 = vrot.lane.b32.xlu0 %v326_v37, %s2572_s3 }
 0x235   :  { %v235_v38 = vpop.permute.xlu0 %234 }
 0x236   :  { %v237_v39 = vmul.f32 %v2326_v25, %v235_v38 }
 0x238   :  { %239 = vrot.lane.b32.xlu1 %v237_v39, %s2576_s14 }
 0x239   :  { %v328_v52 = vpop.permute.xlu0 %327 }
 0x2aa   :  { %v2764_v40 = vpop.permute.xlu1 %239 }
 0x2ab   :  { %2057 = vmatmul.mubr.msk.f32.vlgmr.msra.gmra.mrb[0].mxu1 %vm241_vm15, %v2764_v40 }
 0x2ac   :  { %2231 = vmatpush3.bf16.msra.mxu1 %v2744_v32  ;;  %2078 = vmatprep.mubr.msk.f32.mxu1 %vm2574_vm14, %v2575_v34 }
 0x2ad   :  { %2232 = vmatprep.subr.bf16.mxu1 %v2573_v31 }
 0x2b0   :  { %2234 = vmatpush3.bf16.msra.mxu1 %v2752_v35 }
 0x2b1   :  { %2241 = vmatprep.subr.bf16.mxu1 %v2573_v31 }
 0x37e   :  { %v310_v41 = vpop.f32.mrb[0].mxu1 }
 0x37f   :  { %v315_v42 = vrot.slane %v310_v41, 6  ;;  %v2058_v43 = vpop.f32.mrb[1].mxu1 }
 0x381   :  { %v317_v44 = vadd.f32 %v315_v42, %v2730_v18 }
 0x383   :  { %2329 = vtanh.f32 %v317_v44  ;;  %v1930_v46 = vmul.f32 -1.442695, %v317_v44 }
 0x385   :  { %2331 = vpow2.f32 %v1930_v46 }
 0x38d   :  { %v2330_v45 = vpop.eup %2329 }
 0x38e   :  { %332 = vrot.lane.b32.xlu1 %v2330_v45, %s2572_s3 }
 0x38f   :  { %v2332_v47 = vpop.eup %2331 }
 0x390   :  { %v321_v48 = vadd.f32 1.0, %v2332_v47 }
 0x392   :  { %2333 = vrcp.f32 %v321_v48 }
 0x39c   :  { %v2334_v49 = vpop.eup %2333 }
 0x39d   :  { %v330_v53 = vmul.f32 %v2334_v49, %v328_v52 }
 0x400   :  { %v333_v50 = vpop.permute.xlu1 %332 }
 0x401   :  { %v335_v51 = vmul.f32 %v2334_v49, %v333_v50 }
 0x403   :  { %337 = vrot.lane.b32.xlu1 %v335_v51, %s2572_s3 }
 0x475   :  { %v338_v54 = vpop.permute.xlu1 %337 }
 0x476   :  { %v340_v55 = vadd.f32 %v338_v54, %v330_v53 }
 0x478   :  { %2335 = vtanh.f32 %v340_v55  ;;  %v435_v9 = vrot.slane %v340_v55, 6 }
 0x482   :  { %v2336_v56 = vpop.eup %2335 }
 0x483   :  { %343 = vrot.lane.b32.xlu0 %v2336_v56, %s2572_s3 }
 0x4f5   :  { %v344_v57 = vpop.permute.xlu0 %343 }
 0x4f6   :  { %v346_v58 = vmul.f32 %v2334_v49, %v344_v57 }
 0x4f8   :  { %v348_v59 = vrot.slane %v346_v58, 2 }
 0x4fa   :  { %349 = vrot.lane.b32.xlu1 %v348_v59, %s2576_s14 }
 0x56c   :  { %v2779_v60 = vpop.permute.xlu1 %349 }
 0x56d   :  { %2068 = vmatmul.mubr.msk.f32.vlgmr.msra.gmra.mrb[2].mxu0 %vm241_vm15, %v2779_v60 }
 0x56e   :  { %2237 = vmatpush3.bf16.msra.mxu0 %v2744_v32  ;;  %2089 = vmatprep.mubr.msk.f32.mxu0 %vm2574_vm14, %v2575_v34 }
 0x56f   :  { %2238 = vmatprep.subr.bf16.mxu0 %v2573_v31 }
 0x572   :  { %2240 = vmatpush3.bf16.msra.mxu0 %v2752_v35 }
 0x573   :  { %2247 = vmatprep.subr.bf16.mxu0 %v2573_v31 }
 0x640   :  { %v419_v61 = vpop.f32.mrb[2].mxu0 }
 0x641   :  { %v424_v62 = vrot.slane %v419_v61, 4  ;;  %v2069_v63 = vpop.f32.mrb[3].mxu0 }
 0x643   :  { %v426_v0 = vadd.f32 %v424_v62, %v2726_v17 }
 0x645   :  { %2337 = vtanh.f32 %v426_v0  ;;  %v1932_v2 = vmul.f32 -1.442695, %v426_v0 }
 0x647   :  { %2339 = vpow2.f32 %v1932_v2 }
 0x64f   :  { %v2338_v1 = vpop.eup %2337 }
 0x650   :  { %439 = vrot.lane.b32.xlu0 %v2338_v1, %s2572_s3 }
 0x651   :  { %v2340_v3 = vpop.eup %2339 }
 0x652   :  { %v430_v4 = vadd.f32 1.0, %v2340_v3 }
 0x654   :  { %2341 = vrcp.f32 %v430_v4 }
 0x65e   :  { %v2342_v5 = vpop.eup %2341 }
 0x65f   :  { %v437_v10 = vmul.f32 %v2342_v5, %v435_v9 }
 0x6c2   :  { %v440_v7 = vpop.permute.xlu0 %439 }
 0x6c3   :  { %v442_v8 = vmul.f32 %v2342_v5, %v440_v7 }
 0x6c5   :  { %444 = vrot.lane.b32.xlu1 %v442_v8, %s2572_s3 }
 0x737   :  { %v445_v12 = vpop.permute.xlu1 %444 }
 0x738   :  { %v447_v13 = vadd.f32 %v445_v12, %v437_v10 }
 0x73a   :  { %2343 = vtanh.f32 %v447_v13  ;;  %v542_v37 = vrot.slane %v447_v13, 6 }
 0x744   :  { %v2344_v14 = vpop.eup %2343 }
 0x745   :  { %450 = vrot.lane.b32.xlu0 %v2344_v14, %s2572_s3 }
 0x7b7   :  { %v451_v15 = vpop.permute.xlu0 %450 }
 0x7b8   :  { %v453_v16 = vmul.f32 %v2342_v5, %v451_v15 }
 0x7ba   :  { %v455_v17 = vrot.slane %v453_v16, 4 }
 0x7bc   :  { %456 = vrot.lane.b32.xlu1 %v455_v17, %s2576_s14 }
 0x82e   :  { %v2794_v21 = vpop.permute.xlu1 %456 }
 0x82f   :  { %2079 = vmatmul.mubr.msk.f32.vlgmr.msra.gmra.mrb[2].mxu1 %vm241_vm15, %v2794_v21 }
 0x830   :  { %2243 = vmatpush3.bf16.msra.mxu1 %v2744_v32  ;;  %2100 = vmatprep.mubr.msk.f32.mxu1 %vm2574_vm14, %v2575_v34 }
 0x831   :  { %2244 = vmatprep.subr.bf16.mxu1 %v2573_v31 }
 0x834   :  { %2246 = vmatpush3.bf16.msra.mxu1 %v2752_v35 }
 0x835   :  { %2253 = vmatprep.subr.bf16.mxu1 %v2573_v31 }
 0x902   :  { %v526_v22 = vpop.f32.mrb[2].mxu1 }
 0x903   :  { %v531_v23 = vrot.slane %v526_v22, 2  ;;  %v2080_v24 = vpop.f32.mrb[3].mxu1 }
 0x905   :  { %v533_v25 = vadd.f32 %v531_v23, %v2730_v18 }
 0x907   :  { %2345 = vtanh.f32 %v533_v25  ;;  %v1934_v27 = vmul.f32 -1.442695, %v533_v25 }
 0x909   :  { %2347 = vpow2.f32 %v1934_v27 }
 0x911   :  { %v2346_v26 = vpop.eup %2345 }
 0x912   :  { %546 = vrot.lane.b32.xlu0 %v2346_v26, %s2572_s3 }
 0x913   :  { %v2348_v28 = vpop.eup %2347 }
 0x914   :  { %v537_v29 = vadd.f32 1.0, %v2348_v28 }
 0x916   :  { %2349 = vrcp.f32 %v537_v29 }
 0x920   :  { %v2350_v30 = vpop.eup %2349 }
 0x921   :  { %v544_v38 = vmul.f32 %v2350_v30, %v542_v37 }
 0x984   :  { %v547_v33 = vpop.permute.xlu0 %546 }
 0x985   :  { %v549_v36 = vmul.f32 %v2350_v30, %v547_v33 }
 0x987   :  { %551 = vrot.lane.b32.xlu1 %v549_v36, %s2572_s3 }
 0x9f9   :  { %v552_v39 = vpop.permute.xlu1 %551 }
 0x9fa   :  { %v554_v41 = vadd.f32 %v552_v39, %v544_v38 }
 0x9fc   :  { %2351 = vtanh.f32 %v554_v41  ;;  %v646_v56 = vrot.slane %v554_v41, 6 }
 0xa06   :  { %v2352_v18 = vpop.eup %2351 }
 0xa07   :  { %557 = vrot.lane.b32.xlu0 %v2352_v18, %s2572_s3 }
 0xa79   :  { %v558_v42 = vpop.permute.xlu0 %557 }
 0xa7a   :  { %v560_v43 = vmul.f32 %v2350_v30, %v558_v42 }
 0xa7c   :  { %v562_v44 = vrot.slane %v560_v43, 6 }
 0xa7e   :  { %563 = vrot.lane.b32.xlu1 %v562_v44, %s2576_s14 }
 0xaf0   :  { %v564_v45 = vpop.permute.xlu1 %563 }
 0xaf1   :  { %2090 = vmatmul.mubr.msk.f32.vlgmr.msra.gmra.mrb[4].mxu0 %vm241_vm15, %v564_v45 }
 0xaf2   :  { %2249 = vmatpush3.bf16.msra.mxu0 %v2744_v32  ;;  %2111 = vmatprep.mubr.msk.f32.mxu0 %vm2574_vm14, %v2575_v34 }
 0xaf3   :  { %2250 = vmatprep.subr.bf16.mxu0 %v2573_v31 }
 0xaf6   :  { %2252 = vmatpush3.bf16.msra.mxu0 %v2752_v35 }
 0xbc4   :  { %v633_v46 = vpop.f32.mrb[4].mxu0 }
 0xbc5   :  { %v637_v47 = vadd.f32 %v633_v46, %v2735_v19  ;;  %v2091_v48 = vpop.f32.mrb[5].mxu0 }
 0xbc7   :  { %2353 = vtanh.f32 %v637_v47  ;;  %v1936_v50 = vmul.f32 -1.442695, %v637_v47 }
 0xbc9   :  { %2355 = vpow2.f32 %v1936_v50 }
 0xbd1   :  { %v2354_v49 = vpop.eup %2353 }
 0xbd2   :  { %650 = vrot.lane.b32.xlu0 %v2354_v49, %s2572_s3 }
 0xbd3   :  { %v2356_v51 = vpop.eup %2355 }
 0xbd4   :  { %v641_v52 = vadd.f32 1.0, %v2356_v51 }
 0xbd6   :  { %2357 = vrcp.f32 %v641_v52 }
 0xbe0   :  { %v2358_v53 = vpop.eup %2357 }
 0xbe1   :  { %v648_v57 = vmul.f32 %v2358_v53, %v646_v56 }
 0xc44   :  { %v651_v54 = vpop.permute.xlu0 %650 }
 0xc45   :  { %v653_v55 = vmul.f32 %v2358_v53, %v651_v54 }
 0xc47   :  { %655 = vrot.lane.b32.xlu1 %v653_v55, %s2572_s3 }
 0xcb9   :  { %v656_v58 = vpop.permute.xlu1 %655 }
 0xcba   :  { %v658_v59 = vadd.f32 %v656_v58, %v648_v57 }
 0xcbc   :  { %2359 = vtanh.f32 %v658_v59 }
 0xcc6   :  { %v2360_v61 = vpop.eup %2359 }
 0xcc7   :  { %661 = vrot.lane.b32.xlu0 %v2360_v61, %s2572_s3 }
 0xd39   :  { %v662_v62 = vpop.permute.xlu0 %661 }
 0xd3a   :  { %v664_v63 = vmul.f32 %v2358_v53, %v662_v62 }
 0xd3c   :  { %666 = vrot.lane.b32.xlu1 %v664_v63, %s2576_s14 }
 0xdae   :  { %v667_v0 = vpop.permute.xlu1 %666 }
 0xdaf   :  { %v1004_v1 = vsel %vm96_vm3, %v564_v45, %v667_v0  ;;  %v1006_v2 = vsel %vm96_vm3, %v667_v0, %v564_v45  ;;  %2101 = vmatmul.mubr.msk.f32.vlgmr.msra.gmra.mrb[4].mxu1 %vm241_vm15, %v667_v0 }
 0xdb0   :  { %1005 = vst.msk [vmem:[#allocation2 + $0x6] sm:$0x3] %vm992_vm0, %v1004_v1  ;;  %1007 = vst.msk [vmem:[#allocation2 + $0x8] sm:$0x3] %vm992_vm0, %v1006_v2  ;;  %2255 = vmatpush3.bf16.msra.mxu1 %v2744_v32  ;;  %2122 = vmatprep.mubr.msk.f32.mxu1 %vm2574_vm14, %v2575_v34 }
 0xdb1   :  { %2256 = vmatprep.subr.bf16.mxu1 %v2573_v31 }
 0xdb4   :  { %2258 = vmatpush3.bf16.msra.mxu1 %v2752_v35  ;;  %v752_v35 = vrot.slane %v658_v59, 6 }
 0xdb5   :  { %2267 = vmatprep.subr.bf16.mxu1 %v2573_v31 }
 0xe82   :  { %v736_v3 = vpop.f32.mrb[4].mxu1 }
 0xe83   :  { %v741_v4 = vrot.slane %v736_v3, 6  ;;  %v2102_v5 = vpop.f32.mrb[5].mxu1 }
 0xe84   :  { %v1015_v5 = vld [vmem:[#allocation8 + $0x8] sm:$0xff] }
 0xe85   :  { %v743_v7 = vadd.f32 %v741_v4, %v2739_v20  ;;  %v1014_v4 = vld [vmem:[#allocation8] sm:$0xff] }
 0xe87   :  { %2361 = vtanh.f32 %v743_v7  ;;  %v1938_v9 = vmul.f32 -1.442695, %v743_v7  ;;  %v2259_v7 = vpack.c.bf16 %v1015_v5, %v1014_v4 }
 0xe89   :  { %2363 = vpow2.f32 %v1938_v9  ;;  %v1017_v9 = vld [vmem:[#allocation8 + $0x18] sm:$0xff]  ;;  %2260 = vmatprep.subr.bf16.mxu0 %v2259_v7 }
 0xe91   :  { %v2362_v8 = vpop.eup %2361 }
 0xe92   :  { %756 = vrot.lane.b32.xlu0 %v2362_v8, %s2572_s3  ;;  %v1016_v8 = vld [vmem:[#allocation8 + $0x10] sm:$0xff] }
 0xe93   :  { %v2364_v32 = vpop.eup %2363 }
 0xe94   :  { %v747_v10 = vadd.f32 1.0, %v2364_v32  ;;  %v2263_v32 = vpack.c.bf16 %v1017_v9, %v1016_v8 }
 0xe96   :  { %2365 = vrcp.f32 %v747_v10 }
 0xea0   :  { %v2366_v12 = vpop.eup %2365 }
 0xea1   :  { %v754_v15 = vmul.f32 %v2366_v12, %v752_v35 }
 0xf04   :  { %v757_v13 = vpop.permute.xlu0 %756 }
 0xf05   :  { %v759_v14 = vmul.f32 %v2366_v12, %v757_v13 }
 0xf07   :  { %761 = vrot.lane.b32.xlu1 %v759_v14, %s2572_s3 }
 0xf79   :  { %v762_v16 = vpop.permute.xlu1 %761 }
 0xf7a   :  { %v764_v17 = vadd.f32 %v762_v16, %v754_v15 }
 0xf7c   :  { %2367 = vtanh.f32 %v764_v17  ;;  %v859_v43 = vrot.slane %v764_v17, 6 }
 0xf86   :  { %v2368_v22 = vpop.eup %2367 }
 0xf87   :  { %767 = vrot.lane.b32.xlu0 %v2368_v22, %s2572_s3  ;;  %v1943_v22 = vld [vmem:[%s3057_s6] ss:$0 sm:$0xff] }
 0xff9   :  { %v768_v23 = vpop.permute.xlu0 %767 }
 0xffa   :  { %v770_v24 = vmul.f32 %v2366_v12, %v768_v23 }
 0xffc   :  { %v772_v25 = vrot.slane %v770_v24, 2 }
 0xffe   :  { %773 = vrot.lane.b32.xlu1 %v772_v25, %s2576_s14 }
0x1070   :  { %v774_v26 = vpop.permute.xlu1 %773 }
0x1071   :  { %v1000_v27 = vsel %vm96_vm3, %v2794_v21, %v774_v26  ;;  %v1008_v28 = vsel %vm96_vm3, %v774_v26, %v2794_v21  ;;  %2112 = vmatmul.mubr.msk.f32.vlgmr.msra.gmra.mrb[6].mxu0 %vm241_vm15, %v774_v26 }
0x1072   :  { %1001 = vst.msk [vmem:[#allocation2 + $0x4] sm:$0x3] %vm992_vm0, %v1000_v27  ;;  %1009 = vst.msk [vmem:[#allocation2 + $0xa] sm:$0x3] %vm992_vm0, %v1008_v28  ;;  %2262 = vmatpush3.bf16.msra.mxu0 %v2259_v7 }
0x1073   :  { %2264 = vmatprep.subr.bf16.mxu0 %v2263_v32 }
0x1076   :  { %2266 = vmatpush3.bf16.msra.mxu0 %v2263_v32 }
0x1077   :  { %2273 = vmatprep.subr.bf16.mxu0 %v2573_v31 }
0x1144   :  { %v843_v29 = vpop.f32.mrb[6].mxu0 }
0x1145   :  { %v848_v30 = vrot.slane %v843_v29, 4  ;;  %v2113_v33 = vpop.f32.mrb[7].mxu0 }
0x1147   :  { %v850_v36 = vadd.f32 %v848_v30, %v2735_v19 }
0x1149   :  { %2369 = vtanh.f32 %v850_v36  ;;  %v1940_v38 = vmul.f32 -1.442695, %v850_v36 }
0x114b   :  { %2371 = vpow2.f32 %v1940_v38 }
0x1153   :  { %v2370_v37 = vpop.eup %2369 }
0x1154   :  { %863 = vrot.lane.b32.xlu0 %v2370_v37, %s2572_s3 }
0x1155   :  { %v2372_v39 = vpop.eup %2371 }
0x1156   :  { %v854_v41 = vadd.f32 1.0, %v2372_v39 }
0x1158   :  { %2373 = vrcp.f32 %v854_v41 }
0x1162   :  { %v2374_v21 = vpop.eup %2373 }
0x1163   :  { %v861_v44 = vmul.f32 %v2374_v21, %v859_v43 }
0x11c6   :  { %v864_v18 = vpop.permute.xlu0 %863 }
0x11c7   :  { %v866_v42 = vmul.f32 %v2374_v21, %v864_v18 }
0x11c9   :  { %868 = vrot.lane.b32.xlu1 %v866_v42, %s2572_s3 }
0x123b   :  { %v869_v45 = vpop.permute.xlu1 %868 }
0x123c   :  { %v871_v46 = vadd.f32 %v869_v45, %v861_v44  ;;  %v1018_v44 = vld [vmem:[#allocation10] sm:$0xff]  ;;  %v1019_v45 = vld [vmem:[#allocation10 + $0x8] sm:$0xff] }
0x123e   :  { %2375 = vtanh.f32 %v871_v46  ;;  %v966_v0 = vrot.slane %v871_v46, 6  ;;  %v1020_v46 = vld [vmem:[#allocation10 + $0x10] sm:$0xff] }
0x1248   :  { %v2376_v19 = vpop.eup %2375 }
0x1249   :  { %874 = vrot.lane.b32.xlu0 %v2376_v19, %s2572_s3  ;;  %v2903_v19 = vpack.c.bf16 %v1019_v45, %v1018_v44 }
0x12bb   :  { %v875_v47 = vpop.permute.xlu0 %874 }
0x12bc   :  { %v877_v48 = vmul.f32 %v2374_v21, %v875_v47  ;;  %v2906_v47 = vpack.c.bf16 %v1021_v11, %v1020_v46 }
0x12be   :  { %v879_v49 = vrot.slane %v877_v48, 4 }
0x12c0   :  { %880 = vrot.lane.b32.xlu1 %v879_v49, %s2576_s14 }
0x1332   :  { %v881_v50 = vpop.permute.xlu1 %880 }
0x1333   :  { %v996_v51 = vsel %vm96_vm3, %v2779_v60, %v881_v50  ;;  %v1010_v52 = vsel %vm96_vm3, %v881_v50, %v2779_v60  ;;  %2123 = vmatmul.mubr.msk.f32.vlgmr.msra.gmra.mrb[6].mxu1 %vm241_vm15, %v881_v50 }
0x1334   :  { %997 = vst.msk [vmem:[#allocation2 + $0x2] sm:$0x3] %vm992_vm0, %v996_v51  ;;  %1011 = vst.msk [vmem:[#allocation2 + $0xc] sm:$0x3] %vm992_vm0, %v1010_v52  ;;  %2144 = vmatprep.mubr.msk.f32.mxu1 %vm2574_vm14, %v2575_v34  ;;  %2269 = vmatpush3.bf16.msra.mxu1 %v2903_v19 }
0x1335   :  { %2270 = vmatprep.subr.bf16.mxu1 %v2573_v31 }
0x1338   :  { %2272 = vmatpush3.bf16.msra.mxu1 %v2906_v47 }
0x1339   :  { %2279 = vmatprep.subr.bf16.mxu1 %v2573_v31 }
0x1406   :  { %v950_v53 = vpop.f32.mrb[6].mxu1 }
0x1407   :  { %v955_v54 = vrot.slane %v950_v53, 2  ;;  %v2124_v55 = vpop.f32.mrb[7].mxu1 }
0x1409   :  { %v957_v56 = vadd.f32 %v955_v54, %v2739_v20 }
0x140b   :  { %2377 = vtanh.f32 %v957_v56  ;;  %v1942_v58 = vmul.f32 -1.442695, %v957_v56 }
0x140d   :  { %2379 = vpow2.f32 %v1942_v58 }
0x1415   :  { %v2378_v57 = vpop.eup %2377 }
0x1416   :  { %970 = vrot.lane.b32.xlu0 %v2378_v57, %s2572_s3 }
0x1417   :  { %v2380_v60 = vpop.eup %2379 }
0x1418   :  { %v961_v59 = vadd.f32 1.0, %v2380_v60 }
0x141a   :  { %2381 = vrcp.f32 %v961_v59 }
0x1424   :  { %v2382_v61 = vpop.eup %2381 }
0x1425   :  { %v968_v1 = vmul.f32 %v2382_v61, %v966_v0 }
0x1488   :  { %v971_v62 = vpop.permute.xlu0 %970 }
0x1489   :  { %v973_v63 = vmul.f32 %v2382_v61, %v971_v62 }
0x148b   :  { %975 = vrot.lane.b32.xlu1 %v973_v63, %s2572_s3 }
0x14fd   :  { %v976_v2 = vpop.permute.xlu1 %975 }
0x14fe   :  { %v978_v3 = vadd.f32 %v976_v2, %v968_v1 }
0x1500   :  { %2383 = vtanh.f32 %v978_v3 }
0x150a   :  { %v2384_v20 = vpop.eup %2383 }
0x150b   :  { %981 = vrot.lane.b32.xlu0 %v2384_v20, %s2572_s3 }
0x157d   :  { %v982_v10 = vpop.permute.xlu0 %981 }
0x157e   :  { %v984_v12 = vmul.f32 %v2382_v61, %v982_v10 }
0x1580   :  { %v987_v13 = vrot.slane %v984_v12, 6 }
0x1582   :  { %988 = vrot.lane.b32.xlu1 %v987_v13, %s2576_s14 }
0x15f4   :  { %v989_v14 = vpop.permute.xlu1 %988 }
0x15f5   :  { %v991_v35 = vsel %vm96_vm3, %v2764_v40, %v989_v14  ;;  %v1012_v15 = vsel %vm96_vm3, %v989_v14, %v2764_v40 }
0x15f6   :  { %993 = vst.msk [vmem:[#allocation2] sm:$0x3] %vm992_vm0, %v991_v35  ;;  %1013 = vst.msk [vmem:[#allocation2 + $0xe] sm:$0x3] %vm992_vm0, %v1012_v15 }
0x15fd   :  { %v1023_v16 = vld [vmem:[#allocation2] sm:$0xff]  ;;  %v1024_v17 = vld [vmem:[#allocation2 + $0x8] sm:$0xff] }
0x15fe   :  { %2133 = vmatprep.mubr.msk.f32.mxu0 %vm241_vm15, %v1023_v16 }
0x15ff   :  { %2134 = vmatmul.mubr.msk.f32.vlgmr.msra.gmra.mrb[8].mxu0 %vm241_vm15, %v1024_v17 }
0x1600   :  { %2155 = vmatprep.mubr.msk.f32.mxu0 %vm2574_vm14, %v2575_v34  ;;  %2275 = vmatpush3.bf16.msra.mxu0 %v2903_v19 }
0x1601   :  { %2276 = vmatprep.subr.bf16.mxu0 %v2573_v31 }
0x1604   :  { %2278 = vmatpush3.bf16.msra.mxu0 %v2906_v47 }
0x1605   :  { %2285 = vmatprep.subr.bf16.mxu0 %v2573_v31 }
0x16d2   :  { %v2135_v23 = vpop.f32.mrb[8].mxu0 }
0x16d3   :  { %v1109_v24 = vadd.f32 %v2135_v23, %v1943_v22  ;;  %v1103_v40 = vpop.f32.mrb[9].mxu0 }
0x16d4   :  { %v1104_v25 = vadd.f32 %v1943_v22, %v1103_v40 }
0x16d5   :  { %v1113_v26 = vrot.slane %v1109_v24, 6  ;;  %v1116_v27 = vrot.slane %v1109_v24, 2 }
0x16d6   :  { %v1120_v28 = vrot.slane %v1104_v25, 6  ;;  %v1123_v29 = vrot.slane %v1104_v25, 2 }
0x16d7   :  { %v2886_v30 = vsel %vm2720_vm13, %v1104_v25, %v1113_v26  ;;  %v2890_v33 = vsel %vm2720_vm13, %v1104_v25, %v1116_v27 }
0x16d8   :  { %2385 = vtanh.f32 %v2886_v30  ;;  %v2895_v36 = vsel %vm2720_vm13, %v1109_v24, %v1120_v28  ;;  %v2899_v37 = vsel %vm2720_vm13, %v1109_v24, %v1123_v29  ;;  %v1946_v39 = vmul.f32 -1.442695, %v2886_v30 }
0x16da   :  { %2387 = vpow2.f32 %v1946_v39 }
0x16e2   :  { %v2386_v38 = vpop.eup %2385 }
0x16e3   :  { %1134 = vrot.lane.b32.xlu0 %v2386_v38, %s2572_s3 }
0x16e4   :  { %v2388_v41 = vpop.eup %2387 }
0x16e5   :  { %v1129_v21 = vadd.f32 1.0, %v2388_v41 }
0x16e7   :  { %2389 = vrcp.f32 %v1129_v21 }
0x16f1   :  { %v2390_v18 = vpop.eup %2389 }
0x1755   :  { %v1135_v42 = vpop.permute.xlu0 %1134 }
0x1756   :  { %v1137_v43 = vmul.f32 %v2390_v18, %v1135_v42 }
0x1758   :  { %2391 = vtanh.f32 %v1137_v43  ;;  %v1231_v51 = vrot.slane %v1137_v43, 6 }
0x1762   :  { %v2392_v48 = vpop.eup %2391 }
0x1763   :  { %1140 = vrot.lane.b32.xlu1 %v2392_v48, %s2576_s14 }
0x17d5   :  { %v1141_v49 = vpop.permute.xlu1 %1140 }
0x17d6   :  { %v1143_v50 = vmul.f32 %v2390_v18, %v1141_v49 }
0x17d8   :  { %1145 = vrot.lane.b32.xlu0 %v1143_v50, %s2576_s14 }
0x17dc   :  { %1232 = vrot.lane.b32.xlu0 %v1231_v51, %s2572_s3 }
0x184a   :  { %v2918_v52 = vpop.permute.xlu0 %1145 }
0x184b   :  { %2145 = vmatmul.mubr.msk.f32.vlgmr.msra.gmra.mrb[8].mxu1 %vm241_vm15, %v2918_v52 }
0x184c   :  { %2281 = vmatpush3.bf16.msra.mxu1 %v2903_v19  ;;  %2166 = vmatprep.mubr.msk.f32.mxu1 %vm2574_vm14, %v2575_v34 }
0x184d   :  { %2282 = vmatprep.subr.bf16.mxu1 %v2573_v31 }
0x184e   :  { %v1233_v0 = vpop.permute.xlu0 %1232 }
0x1850   :  { %2284 = vmatpush3.bf16.msra.mxu1 %v2906_v47 }
0x1851   :  { %2291 = vmatprep.subr.bf16.mxu1 %v2573_v31 }
0x191e   :  { %v1215_v53 = vpop.f32.mrb[8].mxu1 }
0x191f   :  { %v1220_v54 = vrot.slane %v1215_v53, 6  ;;  %v2146_v55 = vpop.f32.mrb[9].mxu1 }
0x1921   :  { %v1222_v56 = vadd.f32 %v1220_v54, %v2890_v33 }
0x1923   :  { %2393 = vtanh.f32 %v1222_v56  ;;  %v1948_v58 = vmul.f32 -1.442695, %v1222_v56 }
0x1925   :  { %2395 = vpow2.f32 %v1948_v58 }
0x192d   :  { %v2394_v57 = vpop.eup %2393 }
0x192e   :  { %1237 = vrot.lane.b32.xlu1 %v2394_v57, %s2572_s3 }
0x192f   :  { %v2396_v60 = vpop.eup %2395 }
0x1930   :  { %v1226_v59 = vadd.f32 1.0, %v2396_v60 }
0x1932   :  { %2397 = vrcp.f32 %v1226_v59 }
0x193c   :  { %v2398_v61 = vpop.eup %2397 }
0x193d   :  { %v1235_v1 = vmul.f32 %v2398_v61, %v1233_v0 }
0x19a0   :  { %v1238_v62 = vpop.permute.xlu1 %1237 }
0x19a1   :  { %v1240_v63 = vmul.f32 %v2398_v61, %v1238_v62 }
0x19a3   :  { %1242 = vrot.lane.b32.xlu1 %v1240_v63, %s2572_s3 }
0x1a15   :  { %v1243_v2 = vpop.permute.xlu1 %1242 }
0x1a16   :  { %v1245_v3 = vadd.f32 %v1243_v2, %v1235_v1 }
0x1a18   :  { %2399 = vtanh.f32 %v1245_v3  ;;  %v1340_v23 = vrot.slane %v1245_v3, 6 }
0x1a22   :  { %v2400_v20 = vpop.eup %2399 }
0x1a23   :  { %1248 = vrot.lane.b32.xlu0 %v2400_v20, %s2572_s3 }
0x1a95   :  { %v1249_v4 = vpop.permute.xlu0 %1248 }
0x1a96   :  { %v1251_v5 = vmul.f32 %v2398_v61, %v1249_v4 }
0x1a98   :  { %v1253_v7 = vrot.slane %v1251_v5, 2 }
0x1a9a   :  { %1254 = vrot.lane.b32.xlu1 %v1253_v7, %s2576_s14 }
0x1b0c   :  { %v2933_v8 = vpop.permute.xlu1 %1254 }
0x1b0d   :  { %2156 = vmatmul.mubr.msk.f32.vlgmr.msra.gmra.mrb[10].mxu0 %vm241_vm15, %v2933_v8 }
0x1b0e   :  { %2287 = vmatpush3.bf16.msra.mxu0 %v2903_v19  ;;  %2177 = vmatprep.mubr.msk.f32.mxu0 %vm2574_vm14, %v2575_v34 }
0x1b0f   :  { %2288 = vmatprep.subr.bf16.mxu0 %v2573_v31 }
0x1b12   :  { %2290 = vmatpush3.bf16.msra.mxu0 %v2906_v47 }
0x1b13   :  { %2297 = vmatprep.subr.bf16.mxu0 %v2573_v31 }
0x1be0   :  { %v1324_v9 = vpop.f32.mrb[10].mxu0 }
0x1be1   :  { %v1329_v32 = vrot.slane %v1324_v9, 4  ;;  %v2157_v10 = vpop.f32.mrb[11].mxu0 }
0x1be3   :  { %v1331_v12 = vadd.f32 %v1329_v32, %v2886_v30 }
0x1be5   :  { %2401 = vtanh.f32 %v1331_v12  ;;  %v1950_v14 = vmul.f32 -1.442695, %v1331_v12 }
0x1be7   :  { %2403 = vpow2.f32 %v1950_v14 }
0x1bef   :  { %v2402_v13 = vpop.eup %2401 }
0x1bf0   :  { %1344 = vrot.lane.b32.xlu0 %v2402_v13, %s2572_s3 }
0x1bf1   :  { %v2404_v35 = vpop.eup %2403 }
0x1bf2   :  { %v1335_v15 = vadd.f32 1.0, %v2404_v35 }
0x1bf4   :  { %2405 = vrcp.f32 %v1335_v15 }
0x1bfe   :  { %v2406_v16 = vpop.eup %2405 }
0x1bff   :  { %v1342_v24 = vmul.f32 %v2406_v16, %v1340_v23 }
0x1c62   :  { %v1345_v17 = vpop.permute.xlu0 %1344 }
0x1c63   :  { %v1347_v22 = vmul.f32 %v2406_v16, %v1345_v17 }
0x1c65   :  { %1349 = vrot.lane.b32.xlu1 %v1347_v22, %s2572_s3 }
0x1cd7   :  { %v1350_v40 = vpop.permute.xlu1 %1349 }
0x1cd8   :  { %v1352_v25 = vadd.f32 %v1350_v40, %v1342_v24 }
0x1cda   :  { %2407 = vtanh.f32 %v1352_v25  ;;  %v1447_v48 = vrot.slane %v1352_v25, 6 }
0x1ce4   :  { %v2408_v26 = vpop.eup %2407 }
0x1ce5   :  { %1355 = vrot.lane.b32.xlu0 %v2408_v26, %s2572_s3 }
0x1d57   :  { %v1356_v27 = vpop.permute.xlu0 %1355 }
0x1d58   :  { %v1358_v28 = vmul.f32 %v2406_v16, %v1356_v27 }
0x1d5a   :  { %v1360_v29 = vrot.slane %v1358_v28, 4 }
0x1d5c   :  { %1361 = vrot.lane.b32.xlu1 %v1360_v29, %s2576_s14 }
0x1dce   :  { %v2948_v30 = vpop.permute.xlu1 %1361 }
0x1dcf   :  { %2167 = vmatmul.mubr.msk.f32.vlgmr.msra.gmra.mrb[10].mxu1 %vm241_vm15, %v2948_v30 }
0x1dd0   :  { %2293 = vmatpush3.bf16.msra.mxu1 %v2903_v19  ;;  %2188 = vmatprep.mubr.msk.f32.mxu1 %vm2574_vm14, %v2575_v34 }
0x1dd1   :  { %2294 = vmatprep.subr.bf16.mxu1 %v2573_v31 }
0x1dd4   :  { %2296 = vmatpush3.bf16.msra.mxu1 %v2906_v47 }
0x1dd5   :  { %2303 = vmatprep.subr.bf16.mxu1 %v2573_v31 }
0x1ea2   :  { %v1431_v38 = vpop.f32.mrb[10].mxu1 }
0x1ea3   :  { %v1436_v39 = vrot.slane %v1431_v38, 2  ;;  %v2168_v41 = vpop.f32.mrb[11].mxu1 }
0x1ea5   :  { %v1438_v21 = vadd.f32 %v1436_v39, %v2890_v33 }
0x1ea7   :  { %2409 = vtanh.f32 %v1438_v21  ;;  %v1952_v42 = vmul.f32 -1.442695, %v1438_v21 }
0x1ea9   :  { %2411 = vpow2.f32 %v1952_v42 }
0x1eb1   :  { %v2410_v18 = vpop.eup %2409 }
0x1eb2   :  { %1451 = vrot.lane.b32.xlu0 %v2410_v18, %s2572_s3 }
0x1eb3   :  { %v2412_v43 = vpop.eup %2411 }
0x1eb4   :  { %v1442_v44 = vadd.f32 1.0, %v2412_v43 }
0x1eb6   :  { %2413 = vrcp.f32 %v1442_v44 }
0x1ec0   :  { %v2414_v45 = vpop.eup %2413 }
0x1ec1   :  { %v1449_v49 = vmul.f32 %v2414_v45, %v1447_v48 }
0x1f24   :  { %v1452_v46 = vpop.permute.xlu0 %1451 }
0x1f25   :  { %v1454_v11 = vmul.f32 %v2414_v45, %v1452_v46 }
0x1f27   :  { %1456 = vrot.lane.b32.xlu1 %v1454_v11, %s2572_s3 }
0x1f99   :  { %v1457_v50 = vpop.permute.xlu1 %1456 }
0x1f9a   :  { %v1459_v51 = vadd.f32 %v1457_v50, %v1449_v49 }
0x1f9c   :  { %2415 = vtanh.f32 %v1459_v51  ;;  %v1551_v3 = vrot.slane %v1459_v51, 6 }
0x1fa6   :  { %v2416_v33 = vpop.eup %2415 }
0x1fa7   :  { %1462 = vrot.lane.b32.xlu0 %v2416_v33, %s2572_s3 }
0x2019   :  { %v1463_v53 = vpop.permute.xlu0 %1462 }
0x201a   :  { %v1465_v54 = vmul.f32 %v2414_v45, %v1463_v53 }
0x201c   :  { %v1467_v55 = vrot.slane %v1465_v54, 6 }
0x201e   :  { %1468 = vrot.lane.b32.xlu1 %v1467_v55, %s2576_s14 }
0x2090   :  { %v1469_v56 = vpop.permute.xlu1 %1468 }
0x2091   :  { %2178 = vmatmul.mubr.msk.f32.vlgmr.msra.gmra.mrb[12].mxu0 %vm241_vm15, %v1469_v56 }
0x2092   :  { %2299 = vmatpush3.bf16.msra.mxu0 %v2903_v19  ;;  %2199 = vmatprep.mubr.msk.f32.mxu0 %vm2574_vm14, %v2575_v34 }
0x2093   :  { %2300 = vmatprep.subr.bf16.mxu0 %v2573_v31 }
0x2096   :  { %2302 = vmatpush3.bf16.msra.mxu0 %v2906_v47 }
0x2164   :  { %v1538_v57 = vpop.f32.mrb[12].mxu0 }
0x2165   :  { %v1542_v58 = vadd.f32 %v1538_v57, %v2895_v36  ;;  %v2179_v60 = vpop.f32.mrb[13].mxu0 }
0x2167   :  { %2417 = vtanh.f32 %v1542_v58  ;;  %v1954_v61 = vmul.f32 -1.442695, %v1542_v58 }
0x2169   :  { %2419 = vpow2.f32 %v1954_v61 }
0x2171   :  { %v2418_v59 = vpop.eup %2417 }
0x2172   :  { %1555 = vrot.lane.b32.xlu0 %v2418_v59, %s2572_s3 }
0x2173   :  { %v2420_v62 = vpop.eup %2419 }
0x2174   :  { %v1546_v63 = vadd.f32 1.0, %v2420_v62 }
0x2176   :  { %2421 = vrcp.f32 %v1546_v63 }
0x2180   :  { %v2422_v0 = vpop.eup %2421 }
0x2181   :  { %v1553_v20 = vmul.f32 %v2422_v0, %v1551_v3 }
0x21e4   :  { %v1556_v1 = vpop.permute.xlu0 %1555 }
0x21e5   :  { %v1558_v2 = vmul.f32 %v2422_v0, %v1556_v1 }
0x21e7   :  { %1560 = vrot.lane.b32.xlu1 %v1558_v2, %s2572_s3 }
0x2259   :  { %v1561_v4 = vpop.permute.xlu1 %1560 }
0x225a   :  { %v1563_v5 = vadd.f32 %v1561_v4, %v1553_v20 }
0x225c   :  { %2423 = vtanh.f32 %v1563_v5 }
0x2266   :  { %v2424_v7 = vpop.eup %2423 }
0x2267   :  { %1566 = vrot.lane.b32.xlu0 %v2424_v7, %s2572_s3 }
0x22d9   :  { %v1567_v9 = vpop.permute.xlu0 %1566 }
0x22da   :  { %v1569_v32 = vmul.f32 %v2422_v0, %v1567_v9 }
0x22dc   :  { %1571 = vrot.lane.b32.xlu1 %v1569_v32, %s2576_s14 }
0x234e   :  { %v1572_v10 = vpop.permute.xlu1 %1571 }
0x234f   :  { %v1908_v12 = vsel %vm96_vm3, %v1469_v56, %v1572_v10  ;;  %v1910_v13 = vsel %vm96_vm3, %v1572_v10, %v1469_v56  ;;  %2189 = vmatmul.mubr.msk.f32.vlgmr.msra.gmra.mrb[12].mxu1 %vm241_vm15, %v1572_v10 }
0x2350   :  { %1909 = vst.msk [vmem:[%s3058_s7 + $0x6] sm:$0x3] %vm992_vm0, %v1908_v12  ;;  %1911 = vst.msk [vmem:[%s3058_s7 + $0x8] sm:$0x3] %vm992_vm0, %v1910_v13  ;;  %2305 = vmatpush3.bf16.msra.mxu1 %v2903_v19  ;;  %2210 = vmatprep.mubr.msk.f32.mxu1 %vm2574_vm14, %v2575_v34 }
0x2351   :  { %2306 = vmatprep.subr.bf16.mxu1 %v2573_v31  ;;  %v1657_v31 = vrot.slane %v1563_v5, 6 }
0x2354   :  { %2308 = vmatpush3.bf16.msra.mxu1 %v2906_v47 }
0x2422   :  { %v1641_v14 = vpop.f32.mrb[12].mxu1 }
0x2423   :  { %v1646_v35 = vrot.slane %v1641_v14, 6  ;;  %v2190_v15 = vpop.f32.mrb[13].mxu1 }
0x2425   :  { %v1648_v16 = vadd.f32 %v1646_v35, %v2899_v37 }
0x2427   :  { %2425 = vtanh.f32 %v1648_v16  ;;  %v1956_v22 = vmul.f32 -1.442695, %v1648_v16 }
0x2429   :  { %2427 = vpow2.f32 %v1956_v22 }
0x2431   :  { %v2426_v17 = vpop.eup %2425 }
0x2432   :  { %1661 = vrot.lane.b32.xlu0 %v2426_v17, %s2572_s3 }
0x2433   :  { %v2428_v23 = vpop.eup %2427 }
0x2434   :  { %v1652_v19 = vadd.f32 1.0, %v2428_v23 }
0x2436   :  { %2429 = vrcp.f32 %v1652_v19 }
0x2440   :  { %v2430_v24 = vpop.eup %2429 }
0x2441   :  { %v1659_v47 = vmul.f32 %v2430_v24, %v1657_v31 }
0x24a4   :  { %v1662_v34 = vpop.permute.xlu0 %1661 }
0x24a5   :  { %v1664_v40 = vmul.f32 %v2430_v24, %v1662_v34 }
0x24a7   :  { %1666 = vrot.lane.b32.xlu1 %v1664_v40, %s2572_s3 }
0x2519   :  { %v1667_v25 = vpop.permute.xlu1 %1666 }
0x251a   :  { %v1669_v26 = vadd.f32 %v1667_v25, %v1659_v47 }
0x251c   :  { %2431 = vtanh.f32 %v1669_v26  ;;  %v1764_v51 = vrot.slane %v1669_v26, 6 }
0x2526   :  { %v2432_v27 = vpop.eup %2431 }
0x2527   :  { %1672 = vrot.lane.b32.xlu0 %v2432_v27, %s2572_s3 }
0x2599   :  { %v1673_v28 = vpop.permute.xlu0 %1672 }
0x259a   :  { %v1675_v29 = vmul.f32 %v2430_v24, %v1673_v28 }
0x259c   :  { %v1677_v38 = vrot.slane %v1675_v29, 2 }
0x259e   :  { %1678 = vrot.lane.b32.xlu1 %v1677_v38, %s2576_s14 }
0x2610   :  { %v1679_v39 = vpop.permute.xlu1 %1678 }
0x2611   :  { %v1904_v41 = vsel %vm96_vm3, %v2948_v30, %v1679_v39  ;;  %v1912_v21 = vsel %vm96_vm3, %v1679_v39, %v2948_v30  ;;  %2200 = vmatmul.mubr.msk.f32.vlgmr.msra.gmra.mrb[14].mxu0 %vm241_vm15, %v1679_v39 }
0x2612   :  { %1905 = vst.msk [vmem:[%s3058_s7 + $0x4] sm:$0x3] %vm992_vm0, %v1904_v41  ;;  %1913 = vst.msk [vmem:[%s3058_s7 + $0xa] sm:$0x3] %vm992_vm0, %v1912_v21 }
0x26e4   :  { %v1748_v18 = vpop.f32.mrb[14].mxu0 }
0x26e5   :  { %v1753_v42 = vrot.slane %v1748_v18, 4  ;;  %v2201_v43 = vpop.f32.mrb[15].mxu0 }
0x26e7   :  { %v1755_v44 = vadd.f32 %v1753_v42, %v2895_v36 }
0x26e9   :  { %2433 = vtanh.f32 %v1755_v44  ;;  %v1958_v30 = vmul.f32 -1.442695, %v1755_v44 }
0x26eb   :  { %2435 = vpow2.f32 %v1958_v30 }
0x26f3   :  { %v2434_v45 = vpop.eup %2433 }
0x26f4   :  { %1768 = vrot.lane.b32.xlu0 %v2434_v45, %s2572_s3 }
0x26f5   :  { %v2436_v46 = vpop.eup %2435 }
0x26f6   :  { %v1759_v11 = vadd.f32 1.0, %v2436_v46 }
0x26f8   :  { %2437 = vrcp.f32 %v1759_v11 }
0x2702   :  { %v2438_v48 = vpop.eup %2437 }
0x2703   :  { %v1766_v33 = vmul.f32 %v2438_v48, %v1764_v51 }
0x2766   :  { %v1769_v49 = vpop.permute.xlu0 %1768 }
0x2767   :  { %v1771_v50 = vmul.f32 %v2438_v48, %v1769_v49 }
0x2769   :  { %1773 = vrot.lane.b32.xlu1 %v1771_v50, %s2572_s3 }
0x27db   :  { %v1774_v53 = vpop.permute.xlu1 %1773 }
0x27dc   :  { %v1776_v54 = vadd.f32 %v1774_v53, %v1766_v33 }
0x27de   :  { %2439 = vtanh.f32 %v1776_v54  ;;  %v1871_v7 = vrot.slane %v1776_v54, 6 }
0x27e8   :  { %v2440_v36 = vpop.eup %2439 }
0x27e9   :  { %1779 = vrot.lane.b32.xlu0 %v2440_v36, %s2572_s3 }
0x285b   :  { %v1780_v55 = vpop.permute.xlu0 %1779 }
0x285c   :  { %v1782_v56 = vmul.f32 %v2438_v48, %v1780_v55 }
0x285e   :  { %v1784_v57 = vrot.slane %v1782_v56, 4 }
0x2860   :  { %1785 = vrot.lane.b32.xlu1 %v1784_v57, %s2576_s14 }
0x28d2   :  { %v1786_v58 = vpop.permute.xlu1 %1785 }
0x28d3   :  { %v1900_v60 = vsel %vm96_vm3, %v2933_v8, %v1786_v58  ;;  %v1914_v59 = vsel %vm96_vm3, %v1786_v58, %v2933_v8  ;;  %2211 = vmatmul.mubr.msk.f32.vlgmr.msra.gmra.mrb[14].mxu1 %vm241_vm15, %v1786_v58 }
0x28d4   :  { %1901 = vst.msk [vmem:[%s3058_s7 + $0x2] sm:$0x3] %vm992_vm0, %v1900_v60  ;;  %1915 = vst.msk [vmem:[%s3058_s7 + $0xc] sm:$0x3] %vm992_vm0, %v1914_v59 }
0x29a6   :  { %v1855_v61 = vpop.f32.mrb[14].mxu1 }
0x29a7   :  { %v1860_v62 = vrot.slane %v1855_v61, 2  ;;  %v2212_v63 = vpop.f32.mrb[15].mxu1 }
0x29a9   :  { %v1862_v0 = vadd.f32 %v1860_v62, %v2899_v37 }
0x29ab   :  { %2441 = vtanh.f32 %v1862_v0  ;;  %v1960_v8 = vmul.f32 -1.442695, %v1862_v0 }
0x29ad   :  { %2443 = vpow2.f32 %v1960_v8 }
0x29b5   :  { %v2442_v1 = vpop.eup %2441 }
0x29b6   :  { %1875 = vrot.lane.b32.xlu0 %v2442_v1, %s2572_s3 }
0x29b7   :  { %v2444_v2 = vpop.eup %2443 }
0x29b8   :  { %v1866_v3 = vadd.f32 1.0, %v2444_v2 }
0x29ba   :  { %2445 = vrcp.f32 %v1866_v3 }
0x29c4   :  { %v2446_v20 = vpop.eup %2445 }
0x29c5   :  { %v1873_v9 = vmul.f32 %v2446_v20, %v1871_v7 }
0x2a28   :  { %v1876_v4 = vpop.permute.xlu0 %1875 }
0x2a29   :  { %v1878_v5 = vmul.f32 %v2446_v20, %v1876_v4 }
0x2a2b   :  { %1880 = vrot.lane.b32.xlu1 %v1878_v5, %s2572_s3 }
0x2a9d   :  { %v1881_v32 = vpop.permute.xlu1 %1880 }
0x2a9e   :  { %v1883_v10 = vadd.f32 %v1881_v32, %v1873_v9 }
0x2aa0   :  { %2447 = vtanh.f32 %v1883_v10 }
0x2aaa   :  { %v2448_v37 = vpop.eup %2447 }
0x2aab   :  { %1886 = vrot.lane.b32.xlu0 %v2448_v37, %s2572_s3 }
0x2b1d   :  { %v1887_v12 = vpop.permute.xlu0 %1886 }
0x2b1e   :  { %v1889_v13 = vmul.f32 %v2446_v20, %v1887_v12 }
0x2b20   :  { %v1892_v14 = vrot.slane %v1889_v13, 6 }
0x2b22   :  { %1893 = vrot.lane.b32.xlu1 %v1892_v14, %s2576_s14 }
0x2b94   :  { %v1894_v35 = vpop.permute.xlu1 %1893 }
0x2b95   :  { %v1896_v15 = vsel %vm96_vm3, %v2918_v52, %v1894_v35  ;;  %v1916_v16 = vsel %vm96_vm3, %v1894_v35, %v2918_v52 }
0x2b96   :  { %1897 = vst.msk [vmem:[%s3058_s7] sm:$0x3] %vm992_vm0, %v1896_v15  ;;  %1917 = vst.msk [vmem:[%s3058_s7 + $0xe] sm:$0x3] %vm992_vm0, %v1916_v16 }
0x2b97   :  { %1922 = vsyncpa [#allocation4], 1 }
0x2b98   :  { %1923 = vsyncpa [#allocation6], 1 }
0x2b99   :  { %1924 = vsyncpa [#allocation9], 1 }

</bundles_post_ra>
